<compile_context>
chip_gen: v7x
topology: tpu7x:2x2x1
jax: 0.10.0
libtpu: 0.0.40
codegen_flags: <defaults>
</compile_context>

<pallas_src>
import functools

import numpy as np

import jax
import jax.numpy as jnp
from jax import lax
from jax.experimental import pallas as pl
from jax.experimental.pallas import tpu as pltpu


def _round_up(x, m):
    return ((x + m - 1) // m) * m


def _pick_view_batch(nv):
    # Batch 2-4 views per grid step to fill the MXU M dimension, but keep >= 2
    # grid steps so v7x megacore can shard the view axis across both TCs.
    for cand in (4, 3, 2):
        if nv % cand == 0 and nv // cand >= 2:
            return cand
    return 1


def _default_lane_tile_cap():
    # v7x has 64 MiB physical VMEM -> keep D tiles smaller; v5e/v6e (128 MiB)
    # can take larger lane tiles for better DMA efficiency.
    try:
        kind = jax.devices()[0].device_kind.lower()
    except Exception:  # pragma: no cover
        kind = ""
    return 2048 if "v7" in kind else 4096


def _pick_lane_tile(d, cap):
    """Pick a lane tile that divides D exactly (no host-side padding)."""
    if d <= cap:
        return d
    t = (cap // 128) * 128
    while t >= 128:
        if d % t == 0:
            return t
        t -= 128
    return 0  # no clean divisor -> caller falls back to padding


def _build_avgpool_matrix(h, w, hw_pad, k=5, s=5):
    """AvgPool2d(k, s, pad=0) over row-major (h, w) positions as a matrix."""
    hp = (h - k) // s + 1
    wp = (w - k) // s + 1
    p = np.zeros((hp * wp, hw_pad), np.float32)
    inv = 1.0 / (k * k)
    for po in range(hp):
        for qo in range(wp):
            r = po * wp + qo
            for dr in range(k):
                for dc in range(k):
                    p[r, (po * s + dr) * w + (qo * s + dc)] = inv
    return jnp.asarray(p)


def _kernel1_vmem_limit(vb, hw_pad, c, c1, c2, hpwp):
    # Explicit VMEM budget: pipelined blocks are double-buffered; the f32
    # y / f intermediates live alongside them.  Generous 4x headroom, floored
    # at 32 MiB (covers v5e's 16 MiB scoped default) and capped below the
    # v5e/v6e physical 128 MiB.
    blocks = (vb * hw_pad * c * 2                    # x (bf16)
              + c * c1 * 2 + c1 * 4                  # w1, b1
              + c1 * c2 * 2 + c2 * 4                 # w2, b2
              + hw_pad * c1 * 4 + 4                  # folded score weight + bias
              + hpwp * hw_pad * 4                    # pooling matrix
              + vb * hpwp * c2 * 2 + vb * 4)         # outputs
    need = 2 * blocks + vb * hw_pad * (c1 + c2) * 4
    return int(min(max(4 * need, 32 << 20), 96 << 20))


# ---------------------------------------------------------------------------
# Kernel 1: fused per-view-batch  fcn_1 (1x1 conv + ReLU)  +  GroupSchema raw
#           score  +  fcn_2 (1x1 conv + ReLU)  +  AvgPool2d(5,5).
#           One grid step == Vb views.
# ---------------------------------------------------------------------------
def _fused_view_kernel(x_ref, w1_ref, b1_ref, w2_ref, b2_ref, wsc_ref, bsc_ref,
                       pool_ref, feat_ref, score_ref):
    vb, hw_pad, _ = x_ref.shape

    # fcn_1 stand-in: Vb views flattened onto the MXU M dimension (bf16 in,
    # f32 accumulate), bias + ReLU.
    xb = x_ref[...]                                            # (Vb, HWp, C) bf16
    x2 = xb.reshape(vb * hw_pad, xb.shape[-1])
    y = jnp.dot(x2, w1_ref[...], preferred_element_type=jnp.float32)
    y = jnp.maximum(y + b1_ref[...], 0.0)                      # (Vb*HWp, C1) f32

    # GroupSchema raw scores: OneConvFc (1x1 conv C1->1, fc HW->1; no
    # nonlinearity between) folded into a single [HWp, C1] weight -> a VPU
    # elementwise-mul + reduction per view while y is still in VMEM.
    c1 = y.shape[-1]
    prod = y.reshape(vb, hw_pad, c1) * wsc_ref[...][None, :, :]
    rows = jnp.sum(prod, axis=2)                               # (Vb, HWp)
    sc = jnp.sum(rows, axis=1, keepdims=True)                  # (Vb, 1)
    score_ref[...] = (sc + bsc_ref[...])[None]                 # (1, Vb, 1)

    # fcn_2 stand-in.
    f = jnp.dot(y.astype(jnp.bfloat16), w2_ref[...],
                preferred_element_type=jnp.float32)
    f = jnp.maximum(f + b2_ref[...], 0.0)                      # (Vb*HWp, C2) f32

    # AvgPool2d(5,5) fused in per view via the constant pooling matrix.
    # (Pooling is linear; the downstream group fusion multiplies each view by a
    # scalar, so pooling before fusion is exactly equivalent.)
    p = pool_ref[...]                                          # (hp*wp, HWp) f32
    for v in range(vb):
        f_v = f[v * hw_pad:(v + 1) * hw_pad, :]                # static 8-aligned slice
        pooled_v = jnp.dot(p, f_v, preferred_element_type=jnp.float32)
        feat_ref[v] = pooled_v.astype(feat_ref.dtype)          # bf16 store


def fused_fcn_pool_and_score(x_nhwc, w1, b1, w2, b2, w_sc, b_sc, pool_mat, vb):
    nv, hw_pad, c = x_nhwc.shape
    c1 = w1.shape[1]
    c2 = w2.shape[1]
    hpwp = pool_mat.shape[0]
    steps = nv // vb
    feats, score = pl.pallas_call(
        _fused_view_kernel,
        out_shape=(
            jax.ShapeDtypeStruct((nv, hpwp, c2), jnp.bfloat16),
            jax.ShapeDtypeStruct((steps, vb, 1), jnp.float32),
        ),
        grid=(steps,),
        in_specs=[
            pl.BlockSpec((vb, hw_pad, c), lambda i: (i, 0, 0)),
            # Grid-constant weight blocks (index_map is constant; Pallas does
            # not re-DMA them between steps).
            pl.BlockSpec((c, c1), lambda i: (0, 0)),
            pl.BlockSpec((1, c1), lambda i: (0, 0)),
            pl.BlockSpec((c1, c2), lambda i: (0, 0)),
            pl.BlockSpec((1, c2), lambda i: (0, 0)),
            pl.BlockSpec((hw_pad, c1), lambda i: (0, 0)),
            pl.BlockSpec((1, 1), lambda i: (0, 0)),
            pl.BlockSpec((hpwp, hw_pad), lambda i: (0, 0)),
        ],
        out_specs=(
            pl.BlockSpec((vb, hpwp, c2), lambda i: (i, 0, 0)),
            pl.BlockSpec((1, vb, 1), lambda i: (i, 0, 0)),
        ),
        compiler_params=pltpu.CompilerParams(
            dimension_semantics=("parallel",),
            vmem_limit_bytes=_kernel1_vmem_limit(vb, hw_pad, c, c1, c2, hpwp)),
    )(
        x_nhwc.astype(jnp.bfloat16),
        w1.astype(jnp.bfloat16),
        b1.reshape(1, c1).astype(jnp.float32),
        w2.astype(jnp.bfloat16),
        b2.reshape(1, c2).astype(jnp.float32),
        w_sc.astype(jnp.float32),
        jnp.reshape(b_sc, (1, 1)).astype(jnp.float32),
        pool_mat.astype(jnp.float32),
    )
    return feats, score.reshape(nv)


# ---------------------------------------------------------------------------
# Kernel 2: group_pool / view_pool with the GroupSchema sigmoid(log|.|)+softmax
#           fused in.  Grid over lane-dense D blocks (D = hp*wp*C2, pooled).
# ---------------------------------------------------------------------------
def _group_pool_kernel(sraw_ref, feats_ref, o_ref, *, num_grps, num_views):
    # GroupSchema tail: sigmoid(log|y|) then softmax over views.
    # log(|0|) = -inf -> sigmoid -> 0 matches PyTorch; NaNs propagate silently,
    # exactly as in the reference implementation.
    y = sraw_ref[...]                                          # (N, V)
    t = jnp.log(jnp.abs(y))
    t = 1.0 / (1.0 + jnp.exp(-t))
    m = jnp.max(t, axis=1, keepdims=True)
    e = jnp.exp(t - m)
    s = e / jnp.sum(e, axis=1, keepdims=True)                  # (N, V) view scores

    # Grouping weights (tiny; scores only).
    interval = 1.0 / (num_grps + 1)
    g = lax.broadcasted_iota(jnp.float32, (1, num_grps, 1), 1)  # (1, G, 1)
    lo = g * interval
    hi = jnp.where(g == float(num_grps - 1), 1.1, lo + interval)  # last right = 1.1
    s_b = s[:, None, :]                                        # (N, 1, V)
    mask = jnp.logical_and(s_b >= lo, s_b < hi).astype(jnp.float32)  # (N, G, V)
    count = jnp.sum(mask, axis=2, keepdims=True)                # (N, G, 1)
    safe_count = jnp.maximum(count, 1.0)
    # calc_scores: mean over group members of ceil(score * group_size)
    grp_score = jnp.sum(jnp.ceil(s_b * count) * mask, axis=2, keepdims=True) / safe_count
    grp_score = jnp.where(count > 0.0, grp_score, 0.0)          # empty groups dropped
    wgt = grp_score / safe_count                                # per-member weight
    alpha = jnp.sum(wgt * mask, axis=1)                         # (N, V)
    denom = jnp.sum(grp_score, axis=1)                          # (N, 1)
    # denom >= 1 mathematically (softmax scores + ceil); guard keeps degenerate
    # inputs finite (PyTorch only prints a warning).
    denom = jnp.maximum(denom, 1e-6)

    # Weighted fusion over the small view axis: unrolled VPU accumulate on the
    # bf16 (upcast) pooled features; exact division for parity with PyTorch.
    f = feats_ref[...].astype(jnp.float32)                      # (N, V, tD)
    acc = alpha[:, 0:1] * f[:, 0, :]
    for vv in range(1, num_views):
        acc = acc + alpha[:, vv:vv + 1] * f[:, vv, :]
    o_ref[...] = acc / denom


def group_pool(scores_raw, feats, num_grps=7, tile_d_cap=None):
    # TODO(synk): PyTorch prints a warning when sum(score_grps) < 0.1; omitted.
    n, v, d = feats.shape
    if tile_d_cap is None:
        tile_d_cap = _default_lane_tile_cap()
    td = _pick_lane_tile(d, tile_d_cap)
    d_run = d
    if td == 0:
        # Rare fallback: no 128-multiple divisor of D fits the cap -> pad.
        td = (tile_d_cap // 128) * 128
        d_run = _round_up(d, td)
        feats = jnp.pad(feats, ((0, 0), (0, 0), (0, d_run - d)))
    out = pl.pallas_call(
        functools.partial(_group_pool_kernel, num_grps=num_grps, num_views=v),
        out_shape=jax.ShapeDtypeStruct((n, d_run), jnp.float32),
        grid=(d_run // td,),
        in_specs=[
            pl.BlockSpec((n, v), lambda j: (0, 0)),
            pl.BlockSpec((n, v, td), lambda j: (0, 0, j)),
        ],
        out_specs=pl.BlockSpec((n, td), lambda j: (0, j)),
        compiler_params=pltpu.CompilerParams(dimension_semantics=("parallel",)),
    )(scores_raw.astype(jnp.float32), feats)
    return out[:, :d]


# ---------------------------------------------------------------------------
# Parameters (deterministic synthetic init, mirroring init_weights semantics)
# ---------------------------------------------------------------------------
def init_params(key, c_in, c1, c2, h, w):
    ks = jax.random.split(key, 4)

    def kaiming_uniform(k, shape, fan_in):
        bound = (6.0 / fan_in) ** 0.5
        return jax.random.uniform(k, shape, jnp.float32, -bound, bound)

    def xavier_normal(k, shape, fan_in, fan_out):
        std = (2.0 / (fan_in + fan_out)) ** 0.5
        return jax.random.normal(k, shape, jnp.float32) * std

    return {
        # fcn_1 / fcn_2 stand-ins (see TODO at top of file)
        "w_fcn1": kaiming_uniform(ks[0], (c_in, c1), c_in),
        "b_fcn1": jnp.zeros((c1,), jnp.float32),
        "w_fcn2": kaiming_uniform(ks[1], (c1, c2), c1),
        "b_fcn2": jnp.zeros((c2,), jnp.float32),
        # GroupSchema / OneConvFc (conv 1x1 -> 1 channel, fc H*W -> 1)
        "w_score_conv": kaiming_uniform(ks[2], (c1, 1), c1),
        "b_score_conv": jnp.zeros((1,), jnp.float32),
        "w_score_fc": xavier_normal(ks[3], (h * w, 1), h * w, 1),
        "b_score_fc": jnp.zeros((1,), jnp.float32),
    }


# ---------------------------------------------------------------------------
# GVCNN forward
# ---------------------------------------------------------------------------
def gvcnn_forward(params, x, num_views, num_grps=7):
    n, v, c, h, w = x.shape
    assert v == num_views
    c1 = params["w_fcn1"].shape[1]
    c2 = params["w_fcn2"].shape[1]
    hw = h * w
    hw_pad = _round_up(hw, 8)                 # sublane-aligned tiles in kernel 1
    hp = (h - 5) // 5 + 1                     # AvgPool2d(5, 5, pad=0) output size
    wp = (w - 5) // 5 + 1
    hpwp = hp * wp

    # [N, V, C, H, W] -> [N*V, H*W, C] (NHWC rows per view), H*W padded with zero
    # rows to a multiple of 8.
    x_nhwc = x.transpose(0, 1, 3, 4, 2).reshape(n * v, hw, c)
    if hw_pad != hw:
        x_nhwc = jnp.pad(x_nhwc, ((0, 0), (0, hw_pad - hw), (0, 0)))

    # Fold OneConvFc (1x1 conv C1->1, then fc H*W->1; no nonlinearity between)
    # into a single [H*W, C1] weight + scalar bias; padded rows get zero weight
    # so the score is unchanged.
    w_fc = params["w_score_fc"].reshape(hw, 1)
    w_cv = params["w_score_conv"].reshape(1, c1)
    w_sc = w_fc @ w_cv                                           # (H*W, C1)
    if hw_pad != hw:
        w_sc = jnp.pad(w_sc, ((0, hw_pad - hw), (0, 0)))
    b_sc = params["b_score_conv"][0] * jnp.sum(w_fc) + params["b_score_fc"][0]

    # Constant AvgPool2d(5,5) matrix (zero columns in the padded row range).
    pool_mat = _build_avgpool_matrix(h, w, hw_pad)

    nv = n * v
    vb = _pick_view_batch(nv)

    # fcn_1 + raw GroupSchema score + fcn_2 + avg pool, fully fused per view batch.
    feats, score_raw = fused_fcn_pool_and_score(
        x_nhwc, params["w_fcn1"], params["b_fcn1"],
        params["w_fcn2"], params["b_fcn2"], w_sc, b_sc, pool_mat, vb)
    # feats: [N*V, hp*wp, C2] bf16 (already 5x5-avg-pooled), score_raw: [N*V]

    d = hpwp * c2
    feats = feats.reshape(n, v, d)              # contiguous reshape (no copy)
    scores_raw = score_raw.reshape(n, v)

    # group pooling + group fusion (softmax fused inside the kernel)
    shape_des = group_pool(scores_raw, feats, num_grps=num_grps)   # (N, D) f32

    # Permute the tiny pooled descriptor to PyTorch's NCHW flatten order.
    z = shape_des.reshape(n, hp, wp, c2).transpose(0, 3, 1, 2).reshape(n, c2 * hpwp)
    return z


if __name__ == "__main__":
    key = jax.random.PRNGKey(0)
    # small shapes: N=2 shapes of V=4 views, C=4 channels, 10x10 spatial
    N, V, C, H, W = 2, 4, 4, 10, 10
    C1, C2 = 8, 16
    kx, kp = jax.random.split(key)
    x = jax.random.normal(kx, (N, V, C, H, W), jnp.float32)
    params = init_params(kp, C, C1, C2, H, W)

    z = gvcnn_forward(params, x, num_views=V)
    jax.block_until_ready(z)
    assert z.shape == (N, C2 * (H // 5) * (W // 5)), z.shape
    assert bool(jnp.all(jnp.isfinite(z)))
    print("KERNEL_OK")
</pallas_src>

<mosaic_0001>
module attributes {stable_mosaic.version = 11 : i64} {
  func.func @_fused_view_kernel(%arg0: i32, %arg1: memref<4x104x4xbf16, #tpu.memory_space<vmem>>, %arg2: memref<4x8xbf16, #tpu.memory_space<vmem>>, %arg3: memref<1x8xf32, #tpu.memory_space<vmem>>, %arg4: memref<8x16xbf16, #tpu.memory_space<vmem>>, %arg5: memref<1x16xf32, #tpu.memory_space<vmem>>, %arg6: memref<104x8xf32, #tpu.memory_space<vmem>>, %arg7: memref<1x1xf32, #tpu.memory_space<vmem>>, %arg8: memref<4x104xf32, #tpu.memory_space<vmem>>, %arg9: memref<4x4x16xbf16, #tpu.memory_space<vmem>>, %arg10: memref<1x4x1xf32, #tpu.memory_space<vmem>>) attributes {dimension_semantics = [#tpu.dimension_semantics<parallel>], iteration_bounds = array<i64: 2>, scalar_prefetch = 0 : i64, scratch_operands = 0 : i64, tpu.core_type = #tpu.core_type<tc>, window_params = [{transform_indices = @transform_0, window_bounds = array<i64: 4, 104, 4>}, {pipeline_mode = #tpu.pipeline_mode<synchronous>, transform_indices = @transform_1, window_bounds = array<i64: 4, 8>}, {pipeline_mode = #tpu.pipeline_mode<synchronous>, transform_indices = @transform_2, window_bounds = array<i64: 1, 8>}, {pipeline_mode = #tpu.pipeline_mode<synchronous>, transform_indices = @transform_3, window_bounds = array<i64: 8, 16>}, {pipeline_mode = #tpu.pipeline_mode<synchronous>, transform_indices = @transform_4, window_bounds = array<i64: 1, 16>}, {pipeline_mode = #tpu.pipeline_mode<synchronous>, transform_indices = @transform_5, window_bounds = array<i64: 104, 8>}, {pipeline_mode = #tpu.pipeline_mode<synchronous>, transform_indices = @transform_6, window_bounds = array<i64: 1, 1>}, {pipeline_mode = #tpu.pipeline_mode<synchronous>, transform_indices = @transform_7, window_bounds = array<i64: 4, 104>}, {transform_indices = @transform_8, window_bounds = array<i64: 4, 4, 16>}, {transform_indices = @transform_9, window_bounds = array<i64: 1, 4, 1>}]} {
    %c0 = arith.constant 0 : index
    %c0_0 = arith.constant 0 : index
    %c0_1 = arith.constant 0 : index
    %0 = vector.load %arg1[%c0, %c0_0, %c0_1] : memref<4x104x4xbf16, #tpu.memory_space<vmem>>, vector<4x104x4xbf16>
    %1 = vector.shape_cast %0 : vector<4x104x4xbf16> to vector<416x4xbf16>
    %c0_2 = arith.constant 0 : index
    %c0_3 = arith.constant 0 : index
    %2 = vector.load %arg2[%c0_2, %c0_3] : memref<4x8xbf16, #tpu.memory_space<vmem>>, vector<4x8xbf16>
    %cst = arith.constant dense<0.000000e+00> : vector<416x8xf32>
    %3 = tpu.matmul %1, %2, %cst {dimension_numbers = #tpu.dot_dimension_numbers<[1], [0], [0], [1], [0, 0, 1, 1], [], []>} : vector<416x4xbf16>, vector<4x8xbf16>, vector<416x8xf32> -> vector<416x8xf32>
    %c0_4 = arith.constant 0 : index
    %c0_5 = arith.constant 0 : index
    %4 = vector.load %arg3[%c0_4, %c0_5] : memref<1x8xf32, #tpu.memory_space<vmem>>, vector<1x8xf32>
    %5 = vector.broadcast %4 : vector<1x8xf32> to vector<416x8xf32>
    %6 = arith.addf %3, %5 : vector<416x8xf32>
    %cst_6 = arith.constant 0.000000e+00 : f32
    %7 = vector.broadcast %cst_6 : f32 to vector<416x8xf32>
    %8 = arith.maximumf %6, %7 : vector<416x8xf32>
    %9 = vector.shape_cast %8 : vector<416x8xf32> to vector<4x104x8xf32>
    %c0_7 = arith.constant 0 : index
    %c0_8 = arith.constant 0 : index
    %10 = vector.load %arg6[%c0_7, %c0_8] : memref<104x8xf32, #tpu.memory_space<vmem>>, vector<104x8xf32>
    %11 = vector.shape_cast %10 : vector<104x8xf32> to vector<1x104x8xf32>
    %12 = vector.broadcast %11 : vector<1x104x8xf32> to vector<4x104x8xf32>
    %13 = arith.mulf %9, %12 : vector<4x104x8xf32>
    %cst_9 = arith.constant dense<0.000000e+00> : vector<4x104xf32>
    %14 = vector.multi_reduction <add>, %13, %cst_9 [2] : vector<4x104x8xf32> to vector<4x104xf32>
    %cst_10 = arith.constant dense<0.000000e+00> : vector<4xf32>
    %15 = vector.multi_reduction <add>, %14, %cst_10 [1] : vector<4x104xf32> to vector<4xf32>
    %16 = vector.shape_cast %15 : vector<4xf32> to vector<4x1xf32>
    %c0_11 = arith.constant 0 : index
    %c0_12 = arith.constant 0 : index
    %17 = vector.load %arg7[%c0_11, %c0_12] : memref<1x1xf32, #tpu.memory_space<vmem>>, vector<1x1xf32>
    %18 = vector.broadcast %17 : vector<1x1xf32> to vector<4x1xf32>
    %19 = arith.addf %16, %18 : vector<4x1xf32>
    %20 = vector.shape_cast %19 : vector<4x1xf32> to vector<1x4x1xf32>
    %c0_13 = arith.constant 0 : index
    %c0_14 = arith.constant 0 : index
    %c0_15 = arith.constant 0 : index
    %21 = vector.load %arg10[%c0_13, %c0_14, %c0_15] : memref<1x4x1xf32, #tpu.memory_space<vmem>>, vector<1x4x1xf32>
    tpu.vector_store %arg10[%c0_13, %c0_14, %c0_15], %20 {strides = array<i32>} : memref<1x4x1xf32, #tpu.memory_space<vmem>>, vector<1x4x1xf32>,
    %22 = arith.truncf %8 : vector<416x8xf32> to vector<416x8xbf16>
    %c0_16 = arith.constant 0 : index
    %c0_17 = arith.constant 0 : index
    %23 = vector.load %arg4[%c0_16, %c0_17] : memref<8x16xbf16, #tpu.memory_space<vmem>>, vector<8x16xbf16>
    %cst_18 = arith.constant dense<0.000000e+00> : vector<416x16xf32>
    %24 = tpu.matmul %22, %23, %cst_18 {dimension_numbers = #tpu.dot_dimension_numbers<[1], [0], [0], [1], [0, 0, 1, 1], [], []>} : vector<416x8xbf16>, vector<8x16xbf16>, vector<416x16xf32> -> vector<416x16xf32>
    %c0_19 = arith.constant 0 : index
    %c0_20 = arith.constant 0 : index
    %25 = vector.load %arg5[%c0_19, %c0_20] : memref<1x16xf32, #tpu.memory_space<vmem>>, vector<1x16xf32>
    %26 = vector.broadcast %25 : vector<1x16xf32> to vector<416x16xf32>
    %27 = arith.addf %24, %26 : vector<416x16xf32>
    %cst_21 = arith.constant 0.000000e+00 : f32
    %28 = vector.broadcast %cst_21 : f32 to vector<416x16xf32>
    %29 = arith.maximumf %27, %28 : vector<416x16xf32>
    %c0_22 = arith.constant 0 : index
    %c0_23 = arith.constant 0 : index
    %30 = vector.load %arg8[%c0_22, %c0_23] : memref<4x104xf32, #tpu.memory_space<vmem>>, vector<4x104xf32>
    %31 = vector.extract_strided_slice %29 {offsets = [0, 0], sizes = [104, 16], strides = [1, 1]} : vector<416x16xf32> to vector<104x16xf32>
    %cst_24 = arith.constant dense<0.000000e+00> : vector<4x16xf32>
    %32 = tpu.matmul %30, %31, %cst_24 {dimension_numbers = #tpu.dot_dimension_numbers<[1], [0], [0], [1], [0, 0, 1, 1], [], []>} : vector<4x104xf32>, vector<104x16xf32>, vector<4x16xf32> -> vector<4x16xf32>
    %33 = arith.truncf %32 : vector<4x16xf32> to vector<4x16xbf16>
    %c0_25 = arith.constant 0 : index
    %c0_26 = arith.constant 0 : index
    %c0_27 = arith.constant 0 : index
    %34 = vector.load %arg9[%c0_25, %c0_26, %c0_27] : memref<4x4x16xbf16, #tpu.memory_space<vmem>>, vector<1x4x16xbf16>
    %35 = vector.shape_cast %34 : vector<1x4x16xbf16> to vector<4x16xbf16>
    %36 = vector.shape_cast %33 : vector<4x16xbf16> to vector<1x4x16xbf16>
    tpu.vector_store %arg9[%c0_25, %c0_26, %c0_27], %36 {strides = array<i32>} : memref<4x4x16xbf16, #tpu.memory_space<vmem>>, vector<1x4x16xbf16>,
    %37 = vector.extract_strided_slice %29 {offsets = [104, 0], sizes = [104, 16], strides = [1, 1]} : vector<416x16xf32> to vector<104x16xf32>
    %cst_28 = arith.constant dense<0.000000e+00> : vector<4x16xf32>
    %38 = tpu.matmul %30, %37, %cst_28 {dimension_numbers = #tpu.dot_dimension_numbers<[1], [0], [0], [1], [0, 0, 1, 1], [], []>} : vector<4x104xf32>, vector<104x16xf32>, vector<4x16xf32> -> vector<4x16xf32>
    %39 = arith.truncf %38 : vector<4x16xf32> to vector<4x16xbf16>
    %c1 = arith.constant 1 : index
    %c0_29 = arith.constant 0 : index
    %c0_30 = arith.constant 0 : index
    %40 = vector.load %arg9[%c1, %c0_29, %c0_30] : memref<4x4x16xbf16, #tpu.memory_space<vmem>>, vector<1x4x16xbf16>
    %41 = vector.shape_cast %40 : vector<1x4x16xbf16> to vector<4x16xbf16>
    %42 = vector.shape_cast %39 : vector<4x16xbf16> to vector<1x4x16xbf16>
    tpu.vector_store %arg9[%c1, %c0_29, %c0_30], %42 {strides = array<i32>} : memref<4x4x16xbf16, #tpu.memory_space<vmem>>, vector<1x4x16xbf16>,
    %43 = vector.extract_strided_slice %29 {offsets = [208, 0], sizes = [104, 16], strides = [1, 1]} : vector<416x16xf32> to vector<104x16xf32>
    %cst_31 = arith.constant dense<0.000000e+00> : vector<4x16xf32>
    %44 = tpu.matmul %30, %43, %cst_31 {dimension_numbers = #tpu.dot_dimension_numbers<[1], [0], [0], [1], [0, 0, 1, 1], [], []>} : vector<4x104xf32>, vector<104x16xf32>, vector<4x16xf32> -> vector<4x16xf32>
    %45 = arith.truncf %44 : vector<4x16xf32> to vector<4x16xbf16>
    %c2 = arith.constant 2 : index
    %c0_32 = arith.constant 0 : index
    %c0_33 = arith.constant 0 : index
    %46 = vector.load %arg9[%c2, %c0_32, %c0_33] : memref<4x4x16xbf16, #tpu.memory_space<vmem>>, vector<1x4x16xbf16>
    %47 = vector.shape_cast %46 : vector<1x4x16xbf16> to vector<4x16xbf16>
    %48 = vector.shape_cast %45 : vector<4x16xbf16> to vector<1x4x16xbf16>
    tpu.vector_store %arg9[%c2, %c0_32, %c0_33], %48 {strides = array<i32>} : memref<4x4x16xbf16, #tpu.memory_space<vmem>>, vector<1x4x16xbf16>,
    %49 = vector.extract_strided_slice %29 {offsets = [312, 0], sizes = [104, 16], strides = [1, 1]} : vector<416x16xf32> to vector<104x16xf32>
    %cst_34 = arith.constant dense<0.000000e+00> : vector<4x16xf32>
    %50 = tpu.matmul %30, %49, %cst_34 {dimension_numbers = #tpu.dot_dimension_numbers<[1], [0], [0], [1], [0, 0, 1, 1], [], []>} : vector<4x104xf32>, vector<104x16xf32>, vector<4x16xf32> -> vector<4x16xf32>
    %51 = arith.truncf %50 : vector<4x16xf32> to vector<4x16xbf16>
    %c3 = arith.constant 3 : index
    %c0_35 = arith.constant 0 : index
    %c0_36 = arith.constant 0 : index
    %52 = vector.load %arg9[%c3, %c0_35, %c0_36] : memref<4x4x16xbf16, #tpu.memory_space<vmem>>, vector<1x4x16xbf16>
    %53 = vector.shape_cast %52 : vector<1x4x16xbf16> to vector<4x16xbf16>
    %54 = vector.shape_cast %51 : vector<4x16xbf16> to vector<1x4x16xbf16>
    tpu.vector_store %arg9[%c3, %c0_35, %c0_36], %54 {strides = array<i32>} : memref<4x4x16xbf16, #tpu.memory_space<vmem>>, vector<1x4x16xbf16>,
    return
  }
  func.func @transform_0(%arg0: i32) -> (i32, i32, i32) {
    %c0_i32 = arith.constant 0 : i32
    %c0_i32_0 = arith.constant 0 : i32
    %c0_i32_1 = arith.constant 0 : i32
    return %arg0, %c0_i32, %c0_i32_0 : i32, i32, i32
  }
  func.func @transform_1(%arg0: i32) -> (i32, i32) {
    %c0_i32 = arith.constant 0 : i32
    %c0_i32_0 = arith.constant 0 : i32
    %c0_i32_1 = arith.constant 0 : i32
    return %c0_i32, %c0_i32_0 : i32, i32
  }
  func.func @transform_2(%arg0: i32) -> (i32, i32) {
    %c0_i32 = arith.constant 0 : i32
    %c0_i32_0 = arith.constant 0 : i32
    %c0_i32_1 = arith.constant 0 : i32
    return %c0_i32, %c0_i32_0 : i32, i32
  }
  func.func @transform_3(%arg0: i32) -> (i32, i32) {
    %c0_i32 = arith.constant 0 : i32
    %c0_i32_0 = arith.constant 0 : i32
    %c0_i32_1 = arith.constant 0 : i32
    return %c0_i32, %c0_i32_0 : i32, i32
  }
  func.func @transform_4(%arg0: i32) -> (i32, i32) {
    %c0_i32 = arith.constant 0 : i32
    %c0_i32_0 = arith.constant 0 : i32
    %c0_i32_1 = arith.constant 0 : i32
    return %c0_i32, %c0_i32_0 : i32, i32
  }
  func.func @transform_5(%arg0: i32) -> (i32, i32) {
    %c0_i32 = arith.constant 0 : i32
    %c0_i32_0 = arith.constant 0 : i32
    %c0_i32_1 = arith.constant 0 : i32
    return %c0_i32, %c0_i32_0 : i32, i32
  }
  func.func @transform_6(%arg0: i32) -> (i32, i32) {
    %c0_i32 = arith.constant 0 : i32
    %c0_i32_0 = arith.constant 0 : i32
    %c0_i32_1 = arith.constant 0 : i32
    return %c0_i32, %c0_i32_0 : i32, i32
  }
  func.func @transform_7(%arg0: i32) -> (i32, i32) {
    %c0_i32 = arith.constant 0 : i32
    %c0_i32_0 = arith.constant 0 : i32
    %c0_i32_1 = arith.constant 0 : i32
    return %c0_i32, %c0_i32_0 : i32, i32
  }
  func.func @transform_8(%arg0: i32) -> (i32, i32, i32) {
    %c0_i32 = arith.constant 0 : i32
    %c0_i32_0 = arith.constant 0 : i32
    %c0_i32_1 = arith.constant 0 : i32
    return %arg0, %c0_i32, %c0_i32_0 : i32, i32, i32
  }
  func.func @transform_9(%arg0: i32) -> (i32, i32, i32) {
    %c0_i32 = arith.constant 0 : i32
    %c0_i32_0 = arith.constant 0 : i32
    %c0_i32_1 = arith.constant 0 : i32
    return %arg0, %c0_i32, %c0_i32_0 : i32, i32, i32
  }
}

</mosaic_0001>

<bundles_post_ra>
// kernel: tpu_custom_call.1
= control target key start
LH: loop header
LB: loop body
LE: loop exit
PB: predicated region body
PF: predicated region fallthrough
CT: control target
= control target key end

     0   :  { %s3803_s0 = inlined_call_operand.vmem [shape: bf16[8,104,4], index: 0, kind: input, shape index: {}]   ;;  %s3804_s1 = inlined_call_operand.vmem [shape: bf16[4,8], index: 1, kind: input, shape index: {}]   ;;  %s3805_s2 = inlined_call_operand.vmem [shape: f32[1,8], index: 2, kind: input, shape index: {}]   ;;  %s3806_s3 = inlined_call_operand.vmem [shape: bf16[8,16], index: 3, kind: input, shape index: {}]   ;;  %s3807_s4 = inlined_call_operand.vmem [shape: f32[1,16], index: 4, kind: input, shape index: {}]   ;;  %s3808_s5 = inlined_call_operand.vmem [shape: f32[104,8], index: 5, kind: input, shape index: {}]   ;;  %s3809_s6 = inlined_call_operand.<no memory space> [shape: f32[1,1], index: 6, kind: input, shape index: {}]   ;;  %s3810_s7 = inlined_call_operand.vmem [shape: f32[4,104], index: 7, kind: input, shape index: {}]   ;;  %s3811_s8 = inlined_call_operand.hbm [shape: bf16[8,4,16], index: 8, kind: output, shape index: {0}]   ;;  %s3812_s9 = inlined_call_operand.vmem [shape: f32[2,4,1], index: 9, kind: output, shape index: {1}]  }
   0x1   :  { %v15_v0 = vstv %s3809_s6 }
   0x2   :  { %16 = vst [vmem:[#allocation2] sm:$0x1] %v15_v0 }
   0x3   :  { %17 = vsyncpa [#allocation4], 0 }
   0x4   :  { %19 = vsyncpa [#allocation4 + $0x1], 0  ;;  %s3011_s11 = smov 0   ;;  %s3013_s12 = smov 0  }
   0x5   :  { %s3015_s13 = smov 0   ;;  %s3017_s14 = smov 0  }
   0x6 LB: > { %s3032_s6 = sadd.s32 4294967295, %s2950_s14   ;;  %s2307_s15 = sadd.s32 4294967294, %s2950_s14   ;;  %s2950_s14 = sphi %s3017_s14, %s3818_s14   ;;  %s2946_s13 = sphi %s3015_s13, %s3817_s13   ;;  %s2942_s12 = sphi %s3013_s12, %s3816_s12   ;;  %s2938_s11 = sphi %s3011_s11, %s3815_s11  }
   0x7   : > { %s3036_s16 = sadd.s32 1, %s2950_s14   ;;  %s205_s17 = sadd.s32 1, %s2946_s13 }
   0x8   : > { %s202_s18 = ssub.s32 %s2950_s14, %s3036_s16  ;;  %p215_p0 = scmp.ne.s32.totalorder %s2946_s13, %s2942_s12 }
   0x9   : > { %p203_p1 = scmp.eq.s32.totalorder %s202_s18, 0  ;;  %p216_p2 = scmp.eq.s32.totalorder %s3032_s6, 1 }
   0xa   : > { %p221_p3 = scmp.ne.s32.totalorder %s2942_s12, %s2938_s11  ;;  %p222_p4 = scmp.eq.s32.totalorder %s2307_s15, 1 }
   0xb   : > { %s3047_s19 = scalar_select %p203_p1, %s2946_s13, %s205_s17  }
   0xc   : > { %p3049_p5 = por %p216_p2, %p215_p0  ;;  %p3053_p6 = por %p222_p4, %p221_p3 }
   0xd   : > { %p2310_p7 = scmp.ge.s32.totalorder %s2950_s14, 1  ;;  %p297_p8 = scmp.lt.s32.totalorder %s2950_s14, 3 }
   0xf   : > { %p298_p9 = pnand %p2310_p7, %p297_p8 }
  0x10   : > { %v403_v1 = vld [vmem:[%s3804_s1] sm:$0x3] (!%p298_p9)  ;;  %vm620_vm0 = vcmask (!%p298_p9), 1041408   ;;  %s2312_s24 = sshll.u32 (!%p298_p9), %s3032_s6, 2  ;;  %vm541_vm1 = vcmask (!%p298_p9), 31744   ;;  %vm1606_vm2 = vcmask (!%p298_p9), 1043456  }
  0x11   : > { %301 = sbr.rel (%p298_p9) target bundleno = 805 (0x325), region = 52  ;;  %2815 = vmatprep.subr.msk.bf16.mxu0 (!%p298_p9), %vm620_vm0, %v403_v1  ;;  %v622_v2 = vsel (!%p298_p9), %vm620_vm0, %v403_v1, 0  ;;  %p339_p10 = scmp.lt.s32.totalorder (!%p298_p9), %s2312_s24, 7  ;;  %v1520_v28 = vld [vmem:[%s3806_s3] sm:$0xf] (!%p298_p9)  ;;  %v3133_v37 = vld [vmem:[%s3808_s5 + $0x10] sm:$0xff] (!%p298_p9) }
  0x12   : > { %2520 = vmatpush3.bf16.msra.mxu0 (!%p298_p9), %v622_v2  ;;  %2816 = vmatprep.subr.msk.bf16.mxu1 (!%p298_p9), %vm1606_vm2, %v1520_v28  ;;  %v1608_v29 = vsel (!%p298_p9), %vm1606_vm2, %v1520_v28, 0  ;;  %v3126_v31 = vld [vmem:[%s3805_s2] ss:$0 sm:$0xff] (!%p298_p9)  ;;  %vm982_vm3 = vcmask (!%p298_p9), 64512   ;;  %v3148_v52 = vld [vmem:[%s3808_s5 + $0x18] sm:$0xff] (!%p298_p9)  ;;  %v3156_v57 = vld [vmem:[%s3808_s5 + $0x30] sm:$0xff] (!%p298_p9) }
  0x13   : > { %2574 = vmatpush3.bf16.msra.mxu1 (!%p298_p9), %v1608_v29  ;;  %v3140_v43 = vld [vmem:[%s3808_s5] sm:$0xff] (!%p298_p9)  ;;  %v3165_v63 = vld [vmem:[%s3808_s5 + $0x8] sm:$0xff] (!%p298_p9)  ;;  %vm2953_vm4 = vmmov (!%p298_p9), 0   ;;  %vm1202_vm5 = vcmask (!%p298_p9), 130112   ;;  %vm1209_vm6 = vcmask (!%p298_p9), 195712   ;;  %vm1216_vm7 = vcmask (!%p298_p9), 261312  }
  0x14   : > { %v3171_v2 = vld [vmem:[%s3808_s5 + $0x20] sm:$0xff] (!%p298_p9)  ;;  %vm1223_vm8 = vcmask (!%p298_p9), 326912   ;;  %vm1230_vm9 = vcmask (!%p298_p9), 392512   ;;  %vm1237_vm10 = vcmask (!%p298_p9), 458112   ;;  %vm1244_vm11 = vcmask (!%p298_p9), 523712   ;;  %p346_p11 = scmp.lt.s32.totalorder (!%p298_p9), %s3032_s6, 1 }
  0x15   : > { %vm1251_vm12 = vcmask (!%p298_p9), 589312   ;;  %vm1258_vm13 = vcmask (!%p298_p9), 654912   ;;  %vm1265_vm14 = vcmask (!%p298_p9), 720512   ;;  %vm1272_vm15 = vcmask (!%p298_p9), 786112   ;;  %s329_s29 = sand.u32 (!%p298_p9), 1, %s2942_s12   ;;  %s2408_s17 = sshll.u32 (!%p298_p9), %s3032_s6, 7 }
  0x16   : > { %vm1279_vm0 = vcmask (!%p298_p9), 851712   ;;  %vm1904_vm2 = vcmask (!%p298_p9), 850944   ;;  %s2311_s30 = sshll.u32 (!%p298_p9), %s329_s29, 3  ;;  %s3759_s23 = scalar_lea.hbm (!%p298_p9), %s3811_s8, %s2408_s17 }
  0x17   : > { %s331_s10 = scalar_lea.vmem (!%p298_p9), [#allocation3], %s2311_s30 }
  0x18   : > { %s3820_s24 = smov (!%p339_p10, %s2312_s24), 7  ;;  %s2218_s15 = sshll.u32 %s331_s10, 4  ;;  %s3754_s15 = int_to_ptr.vmem [resolvable:$true] %s2218_s15 }
  0x19   : > { %s2817_s25 = smul.u32 52, %s3820_s24 }
  0x1a   : > { %s347_s24 = scalar_select %p346_p11, %s3032_s6, 1 }
  0x1b   : > { %s3066_s28 = scalar_lea.vmem %s3803_s0, %s2817_s25  ;;  %s2955_s6 = smov [#allocation3]  }
  0x1c   : > { %v2862_v3 = vld [vmem:[%s3066_s28] sm:$0xff]   ;;  %v2863_v4 = vld [vmem:[%s3066_s28 + $0x8] sm:$0xff]   ;;  %v2864_v5 = vld [vmem:[%s3066_s28 + $0x10] sm:$0xff]   ;;  %s2314_s25 = sshll.u32 %s347_s24, 2  ;;  %s3762_s24 = scalar_lea.sflag [#allocation4], %s329_s29 }
  0x1d   : > { %2521 = vmatprep.mubr.msk.bf16.mxu0 %vm541_vm1, %v2862_v3  ;;  %v2865_v6 = vld [vmem:[%s3066_s28 + $0x18] sm:$0xff]   ;;  %v2866_v7 = vld [vmem:[%s3066_s28 + $0x20] sm:$0xff]   ;;  %v2867_v8 = vld [vmem:[%s3066_s28 + $0x28] sm:$0xff]   ;;  %s2892_s26 = sshll.u32 %s2955_s6, 4  ;;  %s2893_s26 = int_to_ptr.vmem [resolvable:$false] %s2892_s26 }
  0x1e   : > { %2522 = vmatmul.mubr.msk.bf16.vlgmr.msra.gmra.mrb[0].mxu0 %vm541_vm1, %v2863_v4  ;;  %v2868_v9 = vld [vmem:[%s3066_s28 + $0x30] sm:$0xff]   ;;  %v2869_v10 = vld [vmem:[%s3066_s28 + $0x38] sm:$0xff]   ;;  %v2870_v11 = vld [vmem:[%s3066_s28 + $0x40] sm:$0xff]   ;;  %s2894_s27 = scalar_lea.vmem %s2893_s26, 256  ;;  %p2895_p1 = scmp.lt.s32.totalorder %s3754_s15, %s2893_s26 }
  0x1f   : > { %2525 = vmatprep.mubr.msk.bf16.mxu0 %vm541_vm1, %v2864_v5  ;;  %v2871_v12 = vld [vmem:[%s3066_s28 + $0x48] sm:$0xff]   ;;  %v2872_v13 = vld [vmem:[%s3066_s28 + $0x50] sm:$0xff]   ;;  %v2873_v14 = vld [vmem:[%s3066_s28 + $0x58] sm:$0xff]  }
  0x20   : > { %v2874_v15 = vld [vmem:[%s3066_s28 + $0x60] sm:$0xff]   ;;  %v2875_v16 = vld [vmem:[%s3066_s28 + $0x68] sm:$0xff]   ;;  %v2876_v17 = vld [vmem:[%s3066_s28 + $0x70] sm:$0xff]  }
  0x21   : > { %v2877_v18 = vld [vmem:[%s3066_s28 + $0x78] sm:$0xff]   ;;  %v2878_v19 = vld [vmem:[%s3066_s28 + $0x80] sm:$0xff]   ;;  %v2879_v20 = vld [vmem:[%s3066_s28 + $0x88] sm:$0xff]  }
  0x22   : > { %v2880_v21 = vld [vmem:[%s3066_s28 + $0x90] sm:$0xff]   ;;  %v2881_v22 = vld [vmem:[%s3066_s28 + $0x98] sm:$0xff]   ;;  %v2882_v23 = vld [vmem:[%s3066_s28 + $0xa0] sm:$0xff]  }
  0x23   : > { %v2883_v24 = vld [vmem:[%s3066_s28 + $0xa8] sm:$0xff]   ;;  %v2884_v25 = vld [vmem:[%s3066_s28 + $0xb0] sm:$0xff]   ;;  %v2885_v26 = vld [vmem:[%s3066_s28 + $0xb8] sm:$0xff]  }
  0x24   : > { %v2886_v27 = vld [vmem:[%s3066_s28 + $0xc0] sm:$0xff]   ;;  %v2887_v30 = vld [vmem:[%s3066_s28 + $0xc8] sm:$0xff]   ;;  %s349_s28 = scalar_lea.vmem %s3812_s9, %s2314_s25  ;;  %s2888_s25 = scalar_lea.vmem %s3754_s15, 128 }
  0x25   : > { %p2889_p12 = scmp.ne.s32.totalorder %s3754_s15, %s2888_s25  ;;  %p2896_p2 = scmp.lt.s32.totalorder %s2894_s27, %s2888_s25 }
  0x26   : > { %2526 = vmatmul.mubr.msk.bf16.gmra.mrb[4].mxu0 %vm541_vm1, %v2865_v6 }
  0x27   : > { %2529 = vmatprep.mubr.msk.bf16.mxu0 %vm541_vm1, %v2866_v7  ;;  %p2890_p13 = pnand %p2889_p12, %p3049_p5  ;;  %p2897_p3 = por %p2896_p2, %p2895_p1 }
  0x29   : > { %p2891_p0 = pneg %p2890_p13 }
  0x2b   : > { %p2898_p4 = pnand %p2897_p3, %p2891_p0 }
  0x2e   : > { %2530 = vmatmul.mubr.msk.bf16.gmra.mrb[8].mxu0 %vm541_vm1, %v2867_v8 }
  0x2f   : > { %2533 = vmatprep.mubr.msk.bf16.mxu0 %vm541_vm1, %v2868_v9 }
  0x36   : > { %2534 = vmatmul.mubr.msk.bf16.gmra.mrb[12].mxu0 %vm541_vm1, %v2869_v10 }
  0x37   : > { %2537 = vmatprep.mubr.msk.bf16.mxu0 %vm541_vm1, %v2870_v11 }
  0x3e   : > { %2538 = vmatmul.mubr.msk.bf16.gmra.mrb[16].mxu0 %vm541_vm1, %v2871_v12 }
  0x3f   : > { %2541 = vmatprep.mubr.msk.bf16.mxu0 %vm541_vm1, %v2872_v13  ;;  %v3181_v13 = vld [vmem:[%s3808_s5 + $0x38] sm:$0xff] }
  0x46   : > { %2542 = vmatmul.mubr.msk.bf16.gmra.mrb[20].mxu0 %vm541_vm1, %v2873_v14 }
  0x47   : > { %2545 = vmatprep.mubr.msk.bf16.mxu0 %vm541_vm1, %v2874_v15 }
  0x4e   : > { %2546 = vmatmul.mubr.msk.bf16.gmra.mrb[24].mxu0 %vm541_vm1, %v2875_v16 }
  0x4f   : > { %2549 = vmatprep.mubr.msk.bf16.mxu0 %vm541_vm1, %v2876_v17 }
  0x56   : > { %2550 = vmatmul.mubr.msk.bf16.gmra.mrb[28].mxu0 %vm541_vm1, %v2877_v18 }
  0x57   : > { %2553 = vmatprep.mubr.msk.bf16.mxu0 %vm541_vm1, %v2878_v19 }
  0x5e   : > { %2554 = vmatmul.mubr.msk.bf16.gmra.mrb[32].mxu0 %vm541_vm1, %v2879_v20 }
  0x5f   : > { %2557 = vmatprep.mubr.msk.bf16.mxu0 %vm541_vm1, %v2880_v21 }
  0x66   : > { %2558 = vmatmul.mubr.msk.bf16.gmra.mrb[36].mxu0 %vm541_vm1, %v2881_v22 }
  0x67   : > { %2561 = vmatprep.mubr.msk.bf16.mxu0 %vm541_vm1, %v2882_v23 }
  0x6e   : > { %2562 = vmatmul.mubr.msk.bf16.gmra.mrb[40].mxu0 %vm541_vm1, %v2883_v24  ;;  %v3195_v24 = vld [vmem:[%s3808_s5 + $0x28] sm:$0xff] }
  0x6f   : > { %2565 = vmatprep.mubr.msk.bf16.mxu0 %vm541_vm1, %v2884_v25 }
  0x76   : > { %2566 = vmatmul.mubr.msk.bf16.gmra.mrb[44].mxu0 %vm541_vm1, %v2885_v26 }
  0x77   : > { %2569 = vmatprep.mubr.msk.bf16.mxu0 %vm541_vm1, %v2886_v27 }
  0x7e   : > { %2570 = vmatmul.mubr.msk.bf16.gmra.mrb[48].mxu0 %vm541_vm1, %v2887_v30  ;;  %vm1473_vm1 = vcmask 1041409  }
  0xf1   : > { %v2523_v32 = vpop.f32.mrb[0].mxu0 }
  0xf2   : > { %v667_v33 = vadd.f32 %v2523_v32, %v3126_v31  ;;  %v658_v34 = vpop.f32.mrb[1].mxu0 }
  0xf3   : > { %v659_v35 = vadd.f32 %v3126_v31, %v658_v34  ;;  %v2524_v36 = vpop.f32.mrb[2].mxu0 }
  0xf4   : > { %v867_v38 = vmax.f32 %v667_v33, 0.0  ;;  %v670_v39 = vadd.f32 %v2524_v36, %v3126_v31  ;;  %v661_v40 = vpop.f32.mrb[3].mxu0 }
  0xf5   : > { %v865_v41 = vmax.f32 %v659_v35, 0.0  ;;  %v662_v42 = vadd.f32 %v3126_v31, %v661_v40  ;;  %v3202_v35 = vld [vmem:[%s3808_s5 + $0x50] sm:$0xff] }
  0xf6   : > { %v868_v44 = vmax.f32 %v670_v39, 0.0  ;;  %v932_v45 = vmul.f32 %v3133_v37, %v867_v38 }
  0xf7   : > { %v866_v46 = vmax.f32 %v662_v42, 0.0  ;;  %v930_v49 = vmul.f32 %v3140_v43, %v865_v41 }
  0xf8   : > { %v1495_v47 = vpack.c.bf16 %v868_v44, %v867_v38  ;;  %v989_v48 = vsel %vm982_vm3, %v932_v45, 0.0  ;;  %v933_v62 = vmul.f32 %v3148_v52, %v868_v44 }
  0xf9   : > { %990 = vadd.xlane.f32.xlu0 %v989_v48  ;;  %v2527_v50 = vpop.f32.mrb[4].mxu0  ;;  %v1494_v51 = vpack.c.bf16 %v866_v46, %v865_v41  ;;  %v983_v61 = vsel %vm982_vm3, %v930_v49, 0.0  ;;  %v931_v6 = vmul.f32 %v3165_v63, %v866_v46 }
  0xfa   : > { %v683_v53 = vadd.f32 %v2527_v50, %v3126_v31  ;;  %v674_v54 = vpop.f32.mrb[5].mxu0  ;;  %v992_v9 = vsel %vm982_vm3, %v933_v62, 0.0 }
  0xfb   : > { %v675_v55 = vadd.f32 %v3126_v31, %v674_v54  ;;  %v2528_v56 = vpop.f32.mrb[6].mxu0  ;;  %2575 = vmatprep.mubr.msk.bf16.mxu1 %vm982_vm3, %v1494_v51  ;;  %v986_v21 = vsel %vm982_vm3, %v931_v6, 0.0 }
  0xfc   : > { %v871_v58 = vmax.f32 %v683_v53, 0.0  ;;  %v686_v59 = vadd.f32 %v2528_v56, %v3126_v31  ;;  %v677_v60 = vpop.f32.mrb[7].mxu0  ;;  %2576 = vmatmul.mubr.msk.bf16.vlgmr.msra.gmra.mrb[0].mxu1 %vm982_vm3, %v1495_v47  ;;  %v3221_v47 = vld [vmem:[%s3808_s5 + $0x40] sm:$0xff] }
  0xfd   : > { %v869_v0 = vmax.f32 %v675_v55, 0.0  ;;  %v678_v1 = vadd.f32 %v3126_v31, %v677_v60  ;;  %984 = vadd.xlane.f32.xlu0 %v983_v61 }
  0xfe   : > { %v872_v3 = vmax.f32 %v686_v59, 0.0  ;;  %v936_v4 = vmul.f32 %v3156_v57, %v871_v58  ;;  %v3235_v59 = vld [vmem:[%s3808_s5 + $0x58] sm:$0xff] }
  0xff   : > { %v870_v5 = vmax.f32 %v678_v1, 0.0  ;;  %v934_v10 = vmul.f32 %v3171_v2, %v869_v0 }
 0x100   : > { %v1497_v7 = vpack.c.bf16 %v872_v3, %v871_v58  ;;  %v1001_v8 = vsel %vm982_vm3, %v936_v4, 0.0  ;;  %v937_v22 = vmul.f32 %v3181_v13, %v872_v3 }
 0x101   : > { %v1496_v11 = vpack.c.bf16 %v870_v5, %v869_v0  ;;  %1002 = vadd.xlane.f32.xlu1 %v1001_v8  ;;  %v2531_v12 = vpop.f32.mrb[8].mxu0  ;;  %993 = vadd.xlane.f32.xlu0 %v992_v9  ;;  %v995_v20 = vsel %vm982_vm3, %v934_v10, 0.0  ;;  %v935_v32 = vmul.f32 %v3195_v24, %v870_v5 }
 0x102   : > { %v699_v14 = vadd.f32 %v2531_v12, %v3126_v31  ;;  %v690_v15 = vpop.f32.mrb[9].mxu0  ;;  %v1004_v30 = vsel %vm982_vm3, %v937_v22, 0.0 }
 0x103   : > { %v691_v16 = vadd.f32 %v3126_v31, %v690_v15  ;;  %v2532_v17 = vpop.f32.mrb[10].mxu0  ;;  %2579 = vmatprep.mubr.msk.bf16.mxu1 %vm982_vm3, %v1496_v11  ;;  %v998_v44 = vsel %vm982_vm3, %v935_v32, 0.0 }
 0x104   : > { %v702_v18 = vadd.f32 %v2532_v17, %v3126_v31  ;;  %v693_v19 = vpop.f32.mrb[11].mxu0  ;;  %2580 = vmatmul.mubr.msk.bf16.gmra.mrb[4].mxu1 %vm982_vm3, %v1497_v7  ;;  %v875_v25 = vmax.f32 %v699_v14, 0.0  ;;  %v3249_v7 = vld [vmem:[%s3808_s5 + $0x48] sm:$0xff] }
 0x105   : > { %v694_v23 = vadd.f32 %v3126_v31, %v693_v19  ;;  %996 = vadd.xlane.f32.xlu1 %v995_v20  ;;  %987 = vadd.xlane.f32.xlu0 %v986_v21  ;;  %v873_v27 = vmax.f32 %v691_v16, 0.0 }
 0x106   : > { %v876_v26 = vmax.f32 %v702_v18, 0.0  ;;  %v940_v45 = vmul.f32 %v3202_v35, %v875_v25 }
 0x107   : > { %v874_v28 = vmax.f32 %v694_v23, 0.0  ;;  %v938_v55 = vmul.f32 %v3221_v47, %v873_v27 }
 0x108   : > { %v1499_v29 = vpack.c.bf16 %v876_v26, %v875_v25  ;;  %v1013_v54 = vsel %vm982_vm3, %v940_v45, 0.0  ;;  %v941_v6 = vmul.f32 %v3235_v59, %v876_v26 }
 0x109   : > { %v1498_v33 = vpack.c.bf16 %v874_v28, %v873_v27  ;;  %v2535_v34 = vpop.f32.mrb[12].mxu0  ;;  %1005 = vadd.xlane.f32.xlu1 %v1004_v30  ;;  %v1007_v5 = vsel %vm982_vm3, %v938_v55, 0.0  ;;  %v939_v14 = vmul.f32 %v3249_v7, %v874_v28 }
 0x10a   : > { %v715_v36 = vadd.f32 %v2535_v34, %v3126_v31  ;;  %v706_v38 = vpop.f32.mrb[13].mxu0  ;;  %v1016_v16 = vsel %vm982_vm3, %v941_v6, 0.0  ;;  %v3272_v34 = vld [vmem:[%s3808_s5 + $0x60] sm:$0xff] }
 0x10b   : > { %v3206_v39 = vadd.f32 %v3126_v31, %v706_v38  ;;  %v2536_v40 = vpop.f32.mrb[14].mxu0  ;;  %2583 = vmatprep.mubr.msk.bf16.mxu1 %vm982_vm3, %v1498_v33  ;;  %v1010_v26 = vsel %vm982_vm3, %v939_v14, 0.0 }
 0x10c   : > { %v3210_v41 = vadd.f32 %v2536_v40, %v3126_v31  ;;  %v709_v42 = vpop.f32.mrb[15].mxu0  ;;  %2584 = vmatmul.mubr.msk.bf16.gmra.mrb[8].mxu1 %vm982_vm3, %v1499_v29  ;;  %v879_v48 = vmax.f32 %v715_v36, 0.0 }
 0x10d   : > { %v3216_v46 = vadd.f32 %v3126_v31, %v709_v42  ;;  %999 = vadd.xlane.f32.xlu1 %v998_v44  ;;  %v877_v50 = vmax.f32 %v3206_v39, 0.0 }
 0x10e   : > { %v880_v49 = vmax.f32 %v3210_v41, 0.0  ;;  %v944_v27 = vmul.f32 %v3165_v63, %v879_v48 }
 0x10f   : > { %v878_v51 = vmax.f32 %v3216_v46, 0.0  ;;  %v942_v42 = vmul.f32 %v3272_v34, %v877_v50 }
 0x110   : > { %v1501_v53 = vpack.c.bf16 %v880_v49, %v879_v48  ;;  %v1025_v45 = vsel %vm982_vm3, %v944_v27, 0.0 }
 0x111   : > { %v1500_v56 = vpack.c.bf16 %v878_v51, %v877_v50  ;;  %v2539_v58 = vpop.f32.mrb[16].mxu0  ;;  %1014 = vadd.xlane.f32.xlu1 %v1013_v54  ;;  %v945_v50 = vmul.f32 %v3133_v37, %v880_v49 }
 0x112   : > { %v731_v60 = vadd.f32 %v2539_v58, %v3126_v31  ;;  %v722_v61 = vpop.f32.mrb[17].mxu0 }
 0x113   : > { %v3239_v62 = vadd.f32 %v3126_v31, %v722_v61  ;;  %v2540_v0 = vpop.f32.mrb[18].mxu0  ;;  %2587 = vmatprep.mubr.msk.bf16.mxu1 %vm982_vm3, %v1500_v56 }
 0x114   : > { %v883_v1 = vmax.f32 %v731_v60, 0.0  ;;  %v734_v3 = vadd.f32 %v2540_v0, %v3126_v31  ;;  %v725_v4 = vpop.f32.mrb[19].mxu0  ;;  %2588 = vmatmul.mubr.msk.bf16.gmra.mrb[12].mxu1 %vm982_vm3, %v1501_v53  ;;  %v1019_v0 = vsel %vm982_vm3, %v942_v42, 0.0 }
 0x115   : > { %v726_v8 = vadd.f32 %v3126_v31, %v725_v4  ;;  %1008 = vadd.xlane.f32.xlu1 %v1007_v5  ;;  %v881_v11 = vmax.f32 %v3239_v62, 0.0 }
 0x116   : > { %v884_v9 = vmax.f32 %v734_v3, 0.0  ;;  %v948_v10 = vmul.f32 %v3195_v24, %v883_v1 }
 0x117   : > { %v882_v12 = vmax.f32 %v726_v8, 0.0  ;;  %v946_v46 = vmul.f32 %v3148_v52, %v881_v11 }
 0x118   : > { %v1503_v15 = vpack.c.bf16 %v884_v9, %v883_v1  ;;  %v1037_v17 = vsel %vm982_vm3, %v948_v10, 0.0  ;;  %v949_v18 = vmul.f32 %v3156_v57, %v884_v9  ;;  %v943_v9 = vmul.f32 %v3140_v43, %v878_v51 }
 0x119   : > { %v1502_v19 = vpack.c.bf16 %v882_v12, %v881_v11  ;;  %v2543_v20 = vpop.f32.mrb[20].mxu0  ;;  %1017 = vadd.xlane.f32.xlu1 %v1016_v16  ;;  %1038 = vadd.xlane.f32.xlu0 %v1037_v17  ;;  %v947_v33 = vmul.f32 %v3171_v2, %v882_v12  ;;  %v1028_v12 = vsel %vm982_vm3, %v945_v50, 0.0 }
 0x11a   : > { %v747_v21 = vadd.f32 %v2543_v20, %v3126_v31  ;;  %v738_v22 = vpop.f32.mrb[21].mxu0  ;;  %v1040_v32 = vsel %vm982_vm3, %v949_v18, 0.0 }
 0x11b   : > { %v739_v23 = vadd.f32 %v3126_v31, %v738_v22  ;;  %v2544_v25 = vpop.f32.mrb[22].mxu0  ;;  %2591 = vmatprep.mubr.msk.bf16.mxu1 %vm982_vm3, %v1502_v19  ;;  %v1034_v48 = vsel %vm982_vm3, %v947_v33, 0.0  ;;  %v1022_v22 = vsel %vm982_vm3, %v943_v9, 0.0 }
 0x11c   : > { %v887_v28 = vmax.f32 %v747_v21, 0.0  ;;  %v750_v29 = vadd.f32 %v2544_v25, %v3126_v31  ;;  %v741_v30 = vpop.f32.mrb[23].mxu0  ;;  %2592 = vmatmul.mubr.msk.bf16.gmra.mrb[16].mxu1 %vm982_vm3, %v1503_v15 }
 0x11d   : > { %v742_v36 = vadd.f32 %v3126_v31, %v741_v30  ;;  %1011 = vadd.xlane.f32.xlu1 %v1010_v26  ;;  %1041 = vadd.xlane.f32.xlu0 %v1040_v32  ;;  %v885_v39 = vmax.f32 %v739_v23, 0.0 }
 0x11e   : > { %v888_v38 = vmax.f32 %v750_v29, 0.0  ;;  %v952_v53 = vmul.f32 %v3249_v7, %v887_v28  ;;  %v1031_v29 = vsel %vm982_vm3, %v946_v46, 0.0 }
 0x11f   : > { %v886_v40 = vmax.f32 %v742_v36, 0.0  ;;  %v950_v3 = vmul.f32 %v3181_v13, %v885_v39 }
 0x120   : > { %v1505_v44 = vpack.c.bf16 %v888_v38, %v887_v28  ;;  %v1049_v1 = vsel %vm982_vm3, %v952_v53, 0.0  ;;  %v953_v16 = vmul.f32 %v3202_v35, %v888_v38 }
 0x121   : > { %v1504_v54 = vpack.c.bf16 %v886_v40, %v885_v39  ;;  %1026 = vadd.xlane.f32.xlu1 %v1025_v45  ;;  %1035 = vadd.xlane.f32.xlu0 %v1034_v48  ;;  %v2547_v55 = vpop.f32.mrb[24].mxu0  ;;  %v1043_v14 = vsel %vm982_vm3, %v950_v3, 0.0  ;;  %v951_v25 = vmul.f32 %v3221_v47, %v886_v40 }
 0x122   : > { %v763_v56 = vadd.f32 %v2547_v55, %v3126_v31  ;;  %v754_v58 = vpop.f32.mrb[25].mxu0  ;;  %v1052_v23 = vsel %vm982_vm3, %v953_v16, 0.0 }
 0x123   : > { %2595 = vmatprep.mubr.msk.bf16.mxu1 %vm982_vm3, %v1504_v54  ;;  %v755_v60 = vadd.f32 %v3126_v31, %v754_v58  ;;  %v2548_v61 = vpop.f32.mrb[26].mxu0  ;;  %v1046_v33 = vsel %vm982_vm3, %v951_v25, 0.0 }
 0x124   : > { %2596 = vmatmul.mubr.msk.bf16.gmra.mrb[20].mxu1 %vm982_vm3, %v1505_v44  ;;  %v766_v4 = vadd.f32 %v2548_v61, %v3126_v31  ;;  %v757_v5 = vpop.f32.mrb[27].mxu0  ;;  %v891_v6 = vmax.f32 %v763_v56, 0.0 }
 0x125   : > { %1020 = vadd.xlane.f32.xlu1 %v1019_v0  ;;  %1050 = vadd.xlane.f32.xlu0 %v1049_v1  ;;  %v758_v41 = vadd.f32 %v3126_v31, %v757_v5  ;;  %v889_v8 = vmax.f32 %v755_v60, 0.0 }
 0x126   : > { %v892_v49 = vmax.f32 %v766_v4, 0.0  ;;  %v956_v39 = vmul.f32 %v3140_v43, %v891_v6 }
 0x127   : > { %v890_v10 = vmax.f32 %v758_v41, 0.0  ;;  %v954_v48 = vmul.f32 %v3235_v59, %v889_v8 }
 0x128   : > { %v1507_v15 = vpack.c.bf16 %v892_v49, %v891_v6  ;;  %v957_v38 = vmul.f32 %v3165_v63, %v892_v49  ;;  %v1061_v56 = vsel %vm982_vm3, %v956_v39, 0.0 }
 0x129   : > { %1029 = vadd.xlane.f32.xlu1 %v1028_v12  ;;  %1044 = vadd.xlane.f32.xlu0 %v1043_v14  ;;  %v1506_v17 = vpack.c.bf16 %v890_v10, %v889_v8  ;;  %v2551_v18 = vpop.f32.mrb[28].mxu0  ;;  %v955_v5 = vmul.f32 %v3272_v34, %v890_v10  ;;  %v1055_v6 = vsel %vm982_vm3, %v954_v48, 0.0 }
 0x12a   : > { %v779_v19 = vadd.f32 %v2551_v18, %v3126_v31  ;;  %v770_v20 = vpop.f32.mrb[29].mxu0  ;;  %v1064_v55 = vsel %vm982_vm3, %v957_v38, 0.0 }
 0x12b   : > { %v3302_v51 = vadd.f32 %v3126_v31, %v770_v20  ;;  %v2552_v21 = vpop.f32.mrb[30].mxu0  ;;  %2599 = vmatprep.mubr.msk.bf16.mxu1 %vm982_vm3, %v1506_v17  ;;  %v1058_v16 = vsel %vm982_vm3, %v955_v5, 0.0 }
 0x12c   : > { %v782_v26 = vadd.f32 %v2552_v21, %v3126_v31  ;;  %v773_v27 = vpop.f32.mrb[31].mxu0  ;;  %2600 = vmatmul.mubr.msk.bf16.gmra.mrb[24].mxu1 %vm982_vm3, %v1507_v15  ;;  %v895_v11 = vmax.f32 %v779_v19, 0.0 }
 0x12d   : > { %1023 = vadd.xlane.f32.xlu1 %v1022_v22  ;;  %1053 = vadd.xlane.f32.xlu0 %v1052_v23  ;;  %v774_v62 = vadd.f32 %v3126_v31, %v773_v27  ;;  %v893_v30 = vmax.f32 %v3302_v51, 0.0 }
 0x12e   : > { %v896_v28 = vmax.f32 %v782_v26, 0.0  ;;  %v960_v58 = vmul.f32 %v3171_v2, %v895_v11 }
 0x12f   : > { %v894_v32 = vmax.f32 %v774_v62, 0.0  ;;  %v958_v51 = vmul.f32 %v3133_v37, %v893_v30 }
 0x130   : > { %v1509_v36 = vpack.c.bf16 %v896_v28, %v895_v11  ;;  %v1073_v41 = vsel %vm982_vm3, %v960_v58, 0.0  ;;  %v961_v8 = vmul.f32 %v3195_v24, %v896_v28 }
 0x131   : > { %1032 = vadd.xlane.f32.xlu1 %v1031_v29  ;;  %1047 = vadd.xlane.f32.xlu0 %v1046_v33  ;;  %v1508_v40 = vpack.c.bf16 %v894_v32, %v893_v30  ;;  %v2555_v42 = vpop.f32.mrb[32].mxu0  ;;  %v959_v46 = vmul.f32 %v3148_v52, %v894_v32  ;;  %v1067_v28 = vsel %vm982_vm3, %v958_v51, 0.0 }
 0x132   : > { %v795_v44 = vadd.f32 %v2555_v42, %v3126_v31  ;;  %v786_v45 = vpop.f32.mrb[33].mxu0  ;;  %v1076_v18 = vsel %vm982_vm3, %v961_v8, 0.0 }
 0x133   : > { %v787_v53 = vadd.f32 %v3126_v31, %v786_v45  ;;  %v2556_v54 = vpop.f32.mrb[34].mxu0  ;;  %2603 = vmatprep.mubr.msk.bf16.mxu1 %vm982_vm3, %v1508_v40  ;;  %v1070_v62 = vsel %vm982_vm3, %v959_v46, 0.0 }
 0x134   : > { %v3324_v50 = vadd.f32 %v2556_v54, %v3126_v31  ;;  %v789_v60 = vpop.f32.mrb[35].mxu0  ;;  %2604 = vmatmul.mubr.msk.bf16.gmra.mrb[28].mxu1 %vm982_vm3, %v1509_v36  ;;  %v899_v0 = vmax.f32 %v795_v44, 0.0 }
 0x135   : > { %1065 = vadd.xlane.f32.xlu1 %v1064_v55  ;;  %1062 = vadd.xlane.f32.xlu0 %v1061_v56  ;;  %v3328_v61 = vadd.f32 %v3126_v31, %v789_v60  ;;  %v897_v3 = vmax.f32 %v787_v53, 0.0 }
 0x136   : > { %v900_v1 = vmax.f32 %v3324_v50, 0.0  ;;  %v964_v11 = vmul.f32 %v3221_v47, %v899_v0 }
 0x137   : > { %v898_v4 = vmax.f32 %v3328_v61, 0.0  ;;  %v962_v44 = vmul.f32 %v3156_v57, %v897_v3 }
 0x138   : > { %v1511_v49 = vpack.c.bf16 %v900_v1, %v899_v0  ;;  %v1085_v40 = vsel %vm982_vm3, %v964_v11, 0.0  ;;  %v965_v58 = vmul.f32 %v3249_v7, %v900_v1 }
 0x139   : > { %1074 = vadd.xlane.f32.xlu1 %v1073_v41  ;;  %1056 = vadd.xlane.f32.xlu0 %v1055_v6  ;;  %v1510_v9 = vpack.c.bf16 %v898_v4, %v897_v3  ;;  %v2559_v12 = vpop.f32.mrb[36].mxu0  ;;  %v1079_v60 = vsel %vm982_vm3, %v962_v44, 0.0 }
 0x13a   : > { %v3339_v14 = vadd.f32 %v2559_v12, %v3126_v31  ;;  %v802_v15 = vpop.f32.mrb[37].mxu0 }
 0x13b   : > { %v3343_v10 = vadd.f32 %v3126_v31, %v802_v15  ;;  %v2560_v17 = vpop.f32.mrb[38].mxu0  ;;  %2607 = vmatprep.mubr.msk.bf16.mxu1 %vm982_vm3, %v1510_v9  ;;  %v1088_v9 = vsel %vm982_vm3, %v965_v58, 0.0 }
 0x13c   : > { %v3348_v19 = vadd.f32 %v2560_v17, %v3126_v31  ;;  %v805_v20 = vpop.f32.mrb[39].mxu0  ;;  %2608 = vmatmul.mubr.msk.bf16.gmra.mrb[32].mxu1 %vm982_vm3, %v1511_v49  ;;  %v903_v22 = vmax.f32 %v3339_v14, 0.0 }
 0x13d   : > { %1077 = vadd.xlane.f32.xlu1 %v1076_v18  ;;  %1059 = vadd.xlane.f32.xlu0 %v1058_v16  ;;  %v3354_v21 = vadd.f32 %v3126_v31, %v805_v20  ;;  %v901_v25 = vmax.f32 %v3343_v10, 0.0 }
 0x13e   : > { %v904_v23 = vmax.f32 %v3348_v19, 0.0  ;;  %v968_v19 = vmul.f32 %v3272_v34, %v903_v22 }
 0x13f   : > { %v902_v26 = vmax.f32 %v3354_v21, 0.0  ;;  %v966_v51 = vmul.f32 %v3202_v35, %v901_v25 }
 0x140   : > { %v1513_v27 = vpack.c.bf16 %v904_v23, %v903_v22  ;;  %v1097_v14 = vsel %vm982_vm3, %v968_v19, 0.0 }
 0x141   : > { %v1512_v29 = vpack.c.bf16 %v902_v26, %v901_v25  ;;  %v2563_v30 = vpop.f32.mrb[40].mxu0  ;;  %1071 = vadd.xlane.f32.xlu1 %v1070_v62  ;;  %1068 = vadd.xlane.f32.xlu0 %v1067_v28  ;;  %v1091_v25 = vsel %vm982_vm3, %v966_v51, 0.0 }
 0x142   : > { %v827_v32 = vadd.f32 %v2563_v30, %v3126_v31  ;;  %v818_v33 = vpop.f32.mrb[41].mxu0  ;;  %v969_v30 = vmul.f32 %v3140_v43, %v904_v23 }
 0x143   : > { %v819_v36 = vadd.f32 %v3126_v31, %v818_v33  ;;  %v2564_v38 = vpop.f32.mrb[42].mxu0  ;;  %2611 = vmatprep.mubr.msk.bf16.mxu1 %vm982_vm3, %v1512_v29 }
 0x144   : > { %v907_v39 = vmax.f32 %v827_v32, 0.0  ;;  %v830_v42 = vadd.f32 %v2564_v38, %v3126_v31  ;;  %v821_v45 = vpop.f32.mrb[43].mxu0  ;;  %2612 = vmatmul.mubr.msk.bf16.gmra.mrb[36].mxu1 %vm982_vm3, %v1513_v27 }
 0x145   : > { %v905_v48 = vmax.f32 %v819_v36, 0.0  ;;  %1086 = vadd.xlane.f32.xlu1 %v1085_v40  ;;  %v822_v53 = vadd.f32 %v3126_v31, %v821_v45 }
 0x146   : > { %v908_v54 = vmax.f32 %v830_v42, 0.0  ;;  %v972_v55 = vmul.f32 %v3148_v52, %v907_v39  ;;  %v963_v52 = vmul.f32 %v3181_v13, %v898_v4  ;;  %v1100_v42 = vsel %vm982_vm3, %v969_v30, 0.0 }
 0x147   : > { %v906_v56 = vmax.f32 %v822_v53, 0.0  ;;  %v970_v3 = vmul.f32 %v3165_v63, %v905_v48 }
 0x148   : > { %v1515_v50 = vpack.c.bf16 %v908_v54, %v907_v39  ;;  %v1109_v0 = vsel %vm982_vm3, %v972_v55, 0.0  ;;  %v973_v12 = vmul.f32 %v3171_v2, %v908_v54  ;;  %v1082_v17 = vsel %vm982_vm3, %v963_v52, 0.0 }
 0x149   : > { %1080 = vadd.xlane.f32.xlu1 %v1079_v60  ;;  %1110 = vadd.xlane.f32.xlu0 %v1109_v0  ;;  %v1514_v5 = vpack.c.bf16 %v906_v56, %v905_v48  ;;  %v2567_v41 = vpop.f32.mrb[44].mxu0  ;;  %v1103_v63 = vsel %vm982_vm3, %v970_v3, 0.0  ;;  %v971_v2 = vmul.f32 %v3133_v37, %v906_v56  ;;  %v2952_v55 = vmov 0.0|0.0  }
 0x14a   : > { %v843_v6 = vadd.f32 %v2567_v41, %v3126_v31  ;;  %v834_v49 = vpop.f32.mrb[45].mxu0  ;;  %v1112_v46 = vsel %vm982_vm3, %v973_v12, 0.0  ;;  %2743 = vmatprep.subr.bf16.mxu0 %v2952_v55  ;;  %2761 = vmatprep.subr.bf16.mxu1 %v2952_v55  ;;  %v1191_v41 = vlaneseq }
 0x14b   : > { %v835_v1 = vadd.f32 %v3126_v31, %v834_v49  ;;  %v2568_v8 = vpop.f32.mrb[46].mxu0  ;;  %2615 = vmatprep.mubr.msk.bf16.mxu1 %vm982_vm3, %v1514_v5  ;;  %v1106_v37 = vsel %vm982_vm3, %v971_v2, 0.0  ;;  %v2954_v49 = vmov 0.0  }
 0x14c   : > { %v846_v15 = vadd.f32 %v2568_v8, %v3126_v31  ;;  %v837_v16 = vpop.f32.mrb[47].mxu0  ;;  %2616 = vmatmul.mubr.msk.bf16.gmra.mrb[40].mxu1 %vm982_vm3, %v1515_v50  ;;  %v911_v4 = vmax.f32 %v843_v6, 0.0  ;;  %2653 = vmatprep.mubr.msk.f32.mxu0 %vm2953_vm4, %v2954_v49 }
 0x14d   : > { %1089 = vadd.xlane.f32.xlu1 %v1088_v9  ;;  %1104 = vadd.xlane.f32.xlu0 %v1103_v63  ;;  %v838_v61 = vadd.f32 %v3126_v31, %v837_v16  ;;  %v909_v18 = vmax.f32 %v835_v1, 0.0 }
 0x14e   : > { %v912_v10 = vmax.f32 %v846_v15, 0.0  ;;  %v976_v36 = vmul.f32 %v3181_v13, %v911_v4 }
 0x14f   : > { %v910_v20 = vmax.f32 %v838_v61, 0.0  ;;  %v974_v48 = vmul.f32 %v3195_v24, %v909_v18  ;;  %v967_v24 = vmul.f32 %v3235_v59, %v902_v26 }
 0x150   : > { %v1517_v27 = vpack.c.bf16 %v912_v10, %v911_v4  ;;  %v1121_v13 = vsel %vm982_vm3, %v976_v36, 0.0 }
 0x151   : > { %1083 = vadd.xlane.f32.xlu1 %v1082_v17  ;;  %1113 = vadd.xlane.f32.xlu0 %v1112_v46  ;;  %v1516_v62 = vpack.c.bf16 %v910_v20, %v909_v18  ;;  %v2571_v11 = vpop.f32.mrb[48].mxu0  ;;  %v1115_v22 = vsel %vm982_vm3, %v974_v48, 0.0  ;;  %v1094_v56 = vsel %vm982_vm3, %v967_v24, 0.0  ;;  %v975_v50 = vmul.f32 %v3156_v57, %v910_v20 }
 0x152   : > { %v859_v28 = vadd.f32 %v2571_v11, %v3126_v31  ;;  %v850_v29 = vpop.f32.mrb[49].mxu0 }
 0x153   : > { %v851_v32 = vadd.f32 %v3126_v31, %v850_v29  ;;  %v2572_v33 = vpop.f32.mrb[50].mxu0  ;;  %2619 = vmatprep.mubr.msk.bf16.mxu1 %vm982_vm3, %v1516_v62  ;;  %v1118_v60 = vsel %vm982_vm3, %v975_v50, 0.0 }
 0x154   : > { %v862_v38 = vadd.f32 %v2572_v33, %v3126_v31  ;;  %v853_v39 = vpop.f32.mrb[51].mxu0  ;;  %2620 = vmatmul.mubr.msk.bf16.gmra.mrb[44].mxu1 %vm982_vm3, %v1517_v27  ;;  %v915_v23 = vmax.f32 %v859_v28, 0.0 }
 0x155   : > { %1092 = vadd.xlane.f32.xlu1 %v1091_v25  ;;  %1107 = vadd.xlane.f32.xlu0 %v1106_v37  ;;  %v854_v43 = vadd.f32 %v3126_v31, %v853_v39  ;;  %v913_v44 = vmax.f32 %v851_v32, 0.0 }
 0x156   : > { %v916_v40 = vmax.f32 %v862_v38, 0.0  ;;  %v980_v5 = vmul.f32 %v3235_v59, %v915_v23  ;;  %v3445_v59 = vshrl.u32 %v1191_v41, 7 }
 0x157   : > { %v914_v45 = vmax.f32 %v854_v43, 0.0  ;;  %v978_v21 = vmul.f32 %v3249_v7, %v913_v44  ;;  %v3438_v7 = vand.u32 127, %v1191_v41 }
 0x158   : > { %v1519_v53 = vpack.c.bf16 %v916_v40, %v915_v23  ;;  %v981_v54 = vmul.f32 %v3272_v34, %v916_v40  ;;  %v977_v34 = vmul.f32 %v3221_v47, %v912_v10  ;;  %v1133_v57 = vsel %vm982_vm3, %v980_v5, 0.0 }
 0x159   : > { %1101 = vadd.xlane.f32.xlu1 %v1100_v42  ;;  %1122 = vadd.xlane.f32.xlu0 %v1121_v13  ;;  %v1518_v31 = vpack.c.bf16 %v914_v45, %v913_v44  ;;  %v1127_v47 = vsel %vm982_vm3, %v978_v21, 0.0  ;;  %v979_v0 = vmul.f32 %v3202_v35, %v914_v45  ;;  %v1197_v52 = vadd.s32 4294967288, %v3438_v7 }
 0x15a   : > { %v1124_v58 = vsel %vm982_vm3, %v977_v34, 0.0  ;;  %v1136_v26 = vsel %vm982_vm3, %v981_v54, 0.0  ;;  %v1204_v1 = vadd.s32 4294967280, %v3438_v7  ;;  %v1211_v8 = vadd.s32 4294967272, %v3438_v7 }
 0x15b   : > { %2623 = vmatprep.mubr.msk.bf16.mxu1 %vm982_vm3, %v1518_v31  ;;  %v1130_v3 = vsel %vm982_vm3, %v979_v0, 0.0  ;;  %v1218_v12 = vadd.s32 4294967264, %v3438_v7  ;;  %v3452_v15 = vsub.s32 %v3438_v7, %v3445_v59  ;;  %v3455_v16 = vsub.s32 %v1197_v52, %v3445_v59 }
 0x15c   : > { %2624 = vmatmul.mubr.msk.bf16.gmra.mrb[48].mxu1 %vm982_vm3, %v1519_v53  ;;  %v3458_v61 = vsub.s32 %v1204_v1, %v3445_v59  ;;  %v3461_v4 = vsub.s32 %v1211_v8, %v3445_v59  ;;  %v1225_v51 = vadd.s32 4294967256, %v3438_v7  ;;  %v1232_v27 = vadd.s32 4294967248, %v3438_v7 }
 0x15d   : > { %1098 = vadd.xlane.f32.xlu1 %v1097_v14  ;;  %1116 = vadd.xlane.f32.xlu0 %v1115_v22  ;;  %v3464_v10 = vsub.s32 %v1218_v12, %v3445_v59  ;;  %v1239_v28 = vadd.s32 4294967240, %v3438_v7  ;;  %v1246_v19 = vadd.s32 4294967232, %v3438_v7  ;;  %v1253_v31 = vadd.s32 4294967224, %v3438_v7 }
 0x15e   : > { %2682 = vmatprep.mubr.msk.f32.mxu1 %vm2953_vm4, %v2954_v49  ;;  %v3477_v33 = vsub.s32 %v1225_v51, %v3445_v59  ;;  %v3481_v37 = vsub.s32 %v1232_v27, %v3445_v59  ;;  %v1260_v14 = vadd.s32 4294967216, %v3438_v7  ;;  %v1267_v24 = vadd.s32 4294967208, %v3438_v7 }
 0x15f   : > { %v3485_v38 = vsub.s32 %v1239_v28, %v3445_v59  ;;  %v3494_v13 = vsub.s32 %v1246_v19, %v3445_v59  ;;  %vm1475_vm3 = vcmask 1042434  }
 0x160   : > { %v3506_v50 = vsub.s32 %v1260_v14, %v3445_v59 }
 0x161   : > { %1095 = vadd.xlane.f32.xlu1 %v1094_v56  ;;  %1125 = vadd.xlane.f32.xlu0 %v1124_v58  ;;  %v3503_v58 = vsub.s32 %v1253_v31, %v3445_v59 }
 0x165   : > { %1119 = vadd.xlane.f32.xlu0 %v1118_v60  ;;  %1137 = vadd.xlane.f32.xlu1 %v1136_v26  ;;  %v3509_v60 = vsub.s32 %v1267_v24, %v3445_v59 }
 0x169   : > { %1128 = vadd.xlane.f32.xlu0 %v1127_v47 }
 0x16d   : > { %1131 = vadd.xlane.f32.xlu0 %v1130_v3 }
 0x171   : > { %1134 = vadd.xlane.f32.xlu0 %v1133_v57 }
 0x186   : > { %v991_v6 = vpop.xlane.xlu0 %990 }
 0x187   : > { %v1208_v2 = vrot.slane %v991_v6, %v3458_v61 }
 0x18a   : > { %v985_v35 = vpop.xlane.xlu0 %984 }
 0x18b   : > { %v1196_v20 = vrot.slane %v985_v35, %v3452_v15 }
 0x18e   : > { %v1003_v9 = vpop.xlane.xlu1 %1002  ;;  %v994_v63 = vpop.xlane.xlu0 %993 }
 0x18f   : > { %v1215_v62 = vrot.slane %v994_v63, %v3461_v4  ;;  %v1236_v23 = vrot.slane %v1003_v9, %v3481_v37 }
 0x192   : > { %v997_v17 = vpop.xlane.xlu1 %996  ;;  %v988_v18 = vpop.xlane.xlu0 %987 }
 0x193   : > { %v1201_v46 = vrot.slane %v988_v18, %v3455_v16  ;;  %v1222_v29 = vrot.slane %v997_v17, %v3464_v10 }
 0x195   : > { %v1203_v11 = vsel %vm1202_vm5, %v1201_v46, %v1196_v20 }
 0x196   : > { %v1210_v30 = vsel %vm1209_vm6, %v1208_v2, %v1203_v11  ;;  %v1006_v32 = vpop.xlane.xlu1 %1005 }
 0x197   : > { %v1217_v25 = vsel %vm1216_vm7, %v1215_v62, %v1210_v30  ;;  %v1243_v40 = vrot.slane %v1006_v32, %v3485_v38 }
 0x198   : > { %v1224_v36 = vsel %vm1223_vm8, %v1222_v29, %v1217_v25  ;;  %v1274_v29 = vadd.s32 4294967200, %v3438_v7 }
 0x19a   : > { %v1000_v39 = vpop.xlane.xlu1 %999  ;;  %v3538_v7 = vsub.s32 %v1274_v29, %v3445_v59 }
 0x19b   : > { %v1229_v43 = vrot.slane %v1000_v39, %v3477_v33 }
 0x19d   : > { %v1231_v42 = vsel %vm1230_vm9, %v1229_v43, %v1224_v36 }
 0x19e   : > { %v1238_v44 = vsel %vm1237_vm10, %v1236_v23, %v1231_v42  ;;  %v1015_v45 = vpop.xlane.xlu1 %1014 }
 0x19f   : > { %v1245_v48 = vsel %vm1244_vm11, %v1243_v40, %v1238_v44  ;;  %v1264_v0 = vrot.slane %v1015_v45, %v3506_v50 }
 0x1a2   : > { %v1009_v53 = vpop.xlane.xlu1 %1008 }
 0x1a3   : > { %v1250_v54 = vrot.slane %v1009_v53, %v3494_v13 }
 0x1a5   : > { %v1252_v22 = vsel %vm1251_vm12, %v1250_v54, %v1245_v48 }
 0x1a6   : > { %v1018_v34 = vpop.xlane.xlu1 %1017  ;;  %v1039_v56 = vpop.xlane.xlu0 %1038 }
 0x1a7   : > { %v1271_v3 = vrot.slane %v1018_v34, %v3509_v60  ;;  %v1308_v28 = vrot.slane %v1039_v56, %v3477_v33 }
 0x1aa   : > { %v1012_v21 = vpop.xlane.xlu1 %1011  ;;  %v1042_v26 = vpop.xlane.xlu0 %1041 }
 0x1ab   : > { %v1257_v47 = vrot.slane %v1012_v21, %v3503_v58  ;;  %v1313_v32 = vrot.slane %v1042_v26, %v3481_v37 }
 0x1ad   : > { %v1259_v5 = vsel %vm1258_vm13, %v1257_v47, %v1252_v22 }
 0x1ae   : > { %v1266_v57 = vsel %vm1265_vm14, %v1264_v0, %v1259_v5  ;;  %v1027_v41 = vpop.xlane.xlu1 %1026  ;;  %v1036_v6 = vpop.xlane.xlu0 %1035  ;;  %v3559_v0 = vld [vmem:[%s3807_s4] ss:$0 sm:$0xff] }
 0x1af   : > { %v1273_v35 = vsel %vm1272_vm15, %v1271_v3, %v1266_v57  ;;  %v1288_v17 = vrot.slane %v1027_v41, %v3455_v16  ;;  %v1303_v62 = vrot.slane %v1036_v6, %v3464_v10 }
 0x1b2   : > { %v1021_v52 = vpop.xlane.xlu1 %1020  ;;  %v1051_v1 = vpop.xlane.xlu0 %1050 }
 0x1b3   : > { %v1328_v42 = vrot.slane %v1051_v1, %v3503_v58  ;;  %v1278_v22 = vrot.slane %v1021_v52, %v3538_v7 }
 0x1b5   : > { %v1280_v26 = vsel %vm1279_vm0, %v1278_v22, %v1273_v35 }
 0x1b6   : > { %v1030_v8 = vpop.xlane.xlu1 %1029  ;;  %v1045_v9 = vpop.xlane.xlu0 %1044 }
 0x1b7   : > { %v1293_v46 = vrot.slane %v1030_v8, %v3458_v61  ;;  %v1318_v43 = vrot.slane %v1045_v9, %v3485_v38 }
 0x1ba   : > { %v1024_v63 = vpop.xlane.xlu1 %1023  ;;  %v1054_v12 = vpop.xlane.xlu0 %1053 }
 0x1bb   : > { %v1284_v18 = vrot.slane %v1024_v63, %v3452_v15  ;;  %v1333_v54 = vrot.slane %v1054_v12, %v3506_v50 }
 0x1bd   : > { %v1289_v20 = vsel %vm1202_vm5, %v1288_v17, %v1284_v18 }
 0x1be   : > { %v1033_v51 = vpop.xlane.xlu1 %1032  ;;  %v1048_v2 = vpop.xlane.xlu0 %1047  ;;  %v1294_v11 = vsel %vm1209_vm6, %v1293_v46, %v1289_v20 }
 0x1bf   : > { %v1298_v27 = vrot.slane %v1033_v51, %v3461_v4  ;;  %v1323_v40 = vrot.slane %v1048_v2, %v3494_v13 }
 0x1c1   : > { %v1299_v30 = vsel %vm1216_vm7, %v1298_v27, %v1294_v11 }
 0x1c2   : > { %v1304_v25 = vsel %vm1223_vm8, %v1303_v62, %v1299_v30  ;;  %v3529_v36 = vpop.xlane.xlu1 %1065  ;;  %v3531_v39 = vpop.xlane.xlu0 %1062 }
 0x1c3   : > { %v1309_v19 = vsel %vm1230_vm9, %v1308_v28, %v1304_v25  ;;  %v1348_v22 = vrot.slane %v3531_v39, %v3452_v15 }
 0x1c4   : > { %v1314_v23 = vsel %vm1237_vm10, %v1313_v32, %v1309_v19 }
 0x1c5   : > { %v1319_v44 = vsel %vm1244_vm11, %v1318_v43, %v1314_v23 }
 0x1c6   : > { %v1324_v45 = vsel %vm1251_vm12, %v1323_v40, %v1319_v44  ;;  %v3543_v48 = vpop.xlane.xlu1 %1074  ;;  %v1057_v53 = vpop.xlane.xlu0 %1056 }
 0x1c7   : > { %v1329_v31 = vsel %vm1258_vm13, %v1328_v42, %v1324_v45  ;;  %v1338_v14 = vrot.slane %v1057_v53, %v3509_v60 }
 0x1c8   : > { %v1334_v59 = vsel %vm1265_vm14, %v1333_v54, %v1329_v31 }
 0x1c9   : > { %v1339_v21 = vsel %vm1272_vm15, %v1338_v14, %v1334_v59  ;;  %v1352_v14 = vrot.slane %v3529_v36, %v3455_v16 }
 0x1ca   : > { %v3550_v24 = vpop.xlane.xlu1 %1077  ;;  %v1060_v34 = vpop.xlane.xlu0 %1059 }
 0x1cb   : > { %v1343_v56 = vrot.slane %v1060_v34, %v3538_v7  ;;  %v1353_v39 = vsel %vm1202_vm5, %v1352_v14, %v1348_v22 }
 0x1cd   : > { %v1344_v47 = vsel %vm1279_vm0, %v1343_v56, %v1339_v21 }
 0x1ce   : > { %v3561_v3 = vpop.xlane.xlu1 %1071  ;;  %v3563_v5 = vsel %vm1473_vm1, %v1344_v47, %v1280_v26  ;;  %v1069_v8 = vpop.xlane.xlu0 %1068 }
 0x1cf   : > { %v2577_v57 = vpop.f32.mrb[0].mxu1  ;;  %v1357_v21 = vrot.slane %v1069_v8, %v3458_v61 }
 0x1d0   : > { %v1653_v41 = vadd.f32 %v2577_v57, %v3559_v0  ;;  %v1644_v6 = vpop.f32.mrb[1].mxu1 }
 0x1d1   : > { %v1645_v52 = vadd.f32 %v3559_v0, %v1644_v6  ;;  %v2578_v1 = vpop.f32.mrb[2].mxu1 }
 0x1d2   : > { %v1656_v35 = vadd.f32 %v2578_v1, %v3559_v0  ;;  %v3568_v9 = vpop.xlane.xlu1 %1086  ;;  %v1647_v63 = vpop.f32.mrb[3].mxu1  ;;  %v1853_v17 = vmax.f32 %v1653_v41, 0.0  ;;  %v1362_v1 = vrot.slane %v3561_v3, %v3461_v4 }
 0x1d3   : > { %v1648_v12 = vadd.f32 %v3559_v0, %v1647_v63  ;;  %v1851_v20 = vmax.f32 %v1645_v52, 0.0  ;;  %v1358_v63 = vsel %vm1209_vm6, %v1357_v21, %v1353_v39  ;;  %v3640_v39 = vld [vmem:[%s3810_s7] sm:$0xf] }
 0x1d4   : > { %v1854_v18 = vmax.f32 %v1656_v35, 0.0 }
 0x1d5   : > { %v1852_v46 = vmax.f32 %v1648_v12, 0.0 }
 0x1d6   : > { %v2747_v51 = vpack.c.bf16 %v1854_v18, %v1853_v17  ;;  %v3571_v2 = vpop.xlane.xlu1 %1080  ;;  %v3573_v27 = vpop.xlane.xlu0 %1110 }
 0x1d7   : > { %v2744_v62 = vpack.c.bf16 %v1852_v46, %v1851_v20  ;;  %v2581_v11 = vpop.f32.mrb[4].mxu1 }
 0x1d8   : > { %v1669_v28 = vadd.f32 %v2581_v11, %v3559_v0  ;;  %v1660_v29 = vpop.f32.mrb[5].mxu1 }
 0x1d9   : > { %v1661_v30 = vadd.f32 %v3559_v0, %v1660_v29  ;;  %v2582_v32 = vpop.f32.mrb[6].mxu1  ;;  %2745 = vmatpush3.bf16.msra.mxu0 %v2744_v62  ;;  %v1363_v62 = vsel %vm1216_vm7, %v1362_v1, %v1358_v63 }
 0x1da   : > { %v1672_v25 = vadd.f32 %v2582_v32, %v3559_v0  ;;  %v3578_v43 = vpop.xlane.xlu1 %1089  ;;  %v1663_v19 = vpop.f32.mrb[7].mxu1  ;;  %2746 = vmatprep.subr.bf16.mxu0 %v2952_v55  ;;  %v1857_v42 = vmax.f32 %v1669_v28, 0.0  ;;  %v1367_v32 = vrot.slane %v3543_v48, %v3464_v10  ;;  %v1372_v48 = vrot.slane %v3550_v24, %v3477_v33 }
 0x1db   : > { %v1664_v23 = vadd.f32 %v3559_v0, %v1663_v19  ;;  %v1105_v40 = vpop.xlane.xlu0 %1104  ;;  %v1855_v45 = vmax.f32 %v1661_v30, 0.0 }
 0x1dc   : > { %v1858_v44 = vmax.f32 %v1672_v25, 0.0  ;;  %v1416_v11 = vrot.slane %v1105_v40, %v3455_v16  ;;  %v1377_v16 = vrot.slane %v3571_v2, %v3481_v37 }
 0x1dd   : > { %v1856_v53 = vmax.f32 %v1664_v23, 0.0  ;;  %2748 = vmatpush3.bf16.msra.mxu0 %v2747_v51 }
 0x1de   : > { %v2753_v54 = vpack.c.bf16 %v1858_v44, %v1857_v42  ;;  %v3582_v31 = vpop.xlane.xlu1 %1083  ;;  %2749 = vmatprep.subr.bf16.mxu0 %v2952_v55  ;;  %v1368_v44 = vsel %vm1223_vm8, %v1367_v32, %v1363_v62 }
 0x1df   : > { %v2750_v59 = vpack.c.bf16 %v1856_v53, %v1855_v45  ;;  %v3589_v34 = vpop.xlane.xlu0 %1113  ;;  %v2585_v56 = vpop.f32.mrb[8].mxu1  ;;  %v1382_v14 = vrot.slane %v3582_v31, %v3485_v38  ;;  %v1373_v2 = vsel %vm1230_vm9, %v1372_v48, %v1368_v44 }
 0x1e0   : > { %v1685_v26 = vadd.f32 %v2585_v56, %v3559_v0  ;;  %v1676_v47 = vpop.f32.mrb[9].mxu1  ;;  %v1378_v24 = vsel %vm1237_vm10, %v1377_v16, %v1373_v2 }
 0x1e1   : > { %v1677_v57 = vadd.f32 %v3559_v0, %v1676_v47  ;;  %v2586_v41 = vpop.f32.mrb[10].mxu1  ;;  %2751 = vmatpush3.bf16.msra.mxu0 %v2750_v59 }
 0x1e2   : > { %v1688_v6 = vadd.f32 %v2586_v41, %v3559_v0  ;;  %v3595_v52 = vpop.xlane.xlu1 %1092  ;;  %v1679_v36 = vpop.f32.mrb[11].mxu1  ;;  %2752 = vmatprep.subr.bf16.mxu0 %v2952_v55  ;;  %v1861_v12 = vmax.f32 %v1685_v26, 0.0 }
 0x1e3   : > { %v1680_v8 = vadd.f32 %v3559_v0, %v1679_v36  ;;  %v1108_v35 = vpop.xlane.xlu0 %1107  ;;  %v1859_v18 = vmax.f32 %v1677_v57, 0.0  ;;  %v1383_v36 = vsel %vm1244_vm11, %v1382_v14, %v1378_v24 }
 0x1e4   : > { %v1862_v17 = vmax.f32 %v1688_v6, 0.0 }
 0x1e5   : > { %v1860_v20 = vmax.f32 %v1680_v8, 0.0  ;;  %2754 = vmatpush3.bf16.msra.mxu0 %v2753_v54 }
 0x1e6   : > { %v2759_v46 = vpack.c.bf16 %v1862_v17, %v1861_v12  ;;  %v1102_v51 = vpop.xlane.xlu1 %1101  ;;  %2755 = vmatprep.subr.bf16.mxu0 %v2952_v55  ;;  %v1387_v12 = vrot.slane %v3568_v9, %v3494_v13 }
 0x1e7   : > { %v2756_v28 = vpack.c.bf16 %v1860_v20, %v1859_v18  ;;  %v1412_v3 = vrot.slane %v1102_v51, %v3452_v15  ;;  %v3607_v29 = vpop.xlane.xlu0 %1122  ;;  %v2589_v30 = vpop.f32.mrb[12].mxu1  ;;  %v1421_v15 = vrot.slane %v1108_v35, %v3458_v61  ;;  %v1426_v61 = vrot.slane %v3573_v27, %v3461_v4 }
 0x1e8   : > { %v1692_v25 = vpop.f32.mrb[13].mxu1  ;;  %v1701_v23 = vadd.f32 %v2589_v30, %v3559_v0  ;;  %v1431_v4 = vrot.slane %v3589_v34, %v3464_v10  ;;  %v1392_v30 = vrot.slane %v3578_v43, %v3503_v58 }
 0x1e9   : > { %v1417_v19 = vsel %vm1202_vm5, %v1416_v11, %v1412_v3  ;;  %v2590_v42 = vpop.f32.mrb[14].mxu1  ;;  %2757 = vmatpush3.bf16.msra.mxu0 %v2756_v28  ;;  %v1693_v45 = vadd.f32 %v3559_v0, %v1692_v25  ;;  %v1397_v25 = vrot.slane %v3595_v52, %v3506_v50  ;;  %vm1477_vm5 = vcmask 1043459  }
 0x1ea   : > { %v1695_v40 = vpop.f32.mrb[15].mxu1  ;;  %2758 = vmatprep.subr.bf16.mxu0 %v2952_v55  ;;  %v1422_v22 = vsel %vm1209_vm6, %v1421_v15, %v1417_v19  ;;  %v1865_v59 = vmax.f32 %v1701_v23, 0.0  ;;  %v3629_v21 = vpop.xlane.xlu1 %1098  ;;  %v1704_v47 = vadd.f32 %v2590_v42, %v3559_v0  ;;  %vm1480_vm6 = vcmask 846848  }
 0x1eb   : > { %v1696_v53 = vadd.f32 %v3559_v0, %v1695_v40  ;;  %v1117_v54 = vpop.xlane.xlu0 %1116  ;;  %v1863_v26 = vmax.f32 %v1693_v45, 0.0  ;;  %v1427_v57 = vsel %vm1216_vm7, %v1426_v61, %v1422_v22  ;;  %vm1979_vm7 = vcmask 123904  }
 0x1ec   : > { %v1436_v1 = vrot.slane %v1117_v54, %v3477_v33  ;;  %v1432_v10 = vsel %vm1223_vm8, %v1431_v4, %v1427_v57  ;;  %v1866_v17 = vmax.f32 %v1704_v47, 0.0 }
 0x1ed   : > { %v1864_v56 = vmax.f32 %v1696_v53, 0.0  ;;  %2760 = vmatpush3.bf16.msra.mxu0 %v2759_v46  ;;  %v1388_v46 = vsel %vm1251_vm12, %v1387_v12, %v1383_v36 }
 0x1ee   : > { %2651 = vmatprep.subr.mxu0 %v2954_v49  ;;  %v1437_v9 = vsel %vm1230_vm9, %v1436_v1, %v1432_v10  ;;  %v1096_v62 = vpop.xlane.xlu1 %1095  ;;  %v1393_v16 = vsel %vm1258_vm13, %v1392_v30, %v1388_v46 }
 0x1ef   : > { %v2762_v31 = vpack.c.bf16 %v1865_v59, %v1864_v56  ;;  %v1126_v41 = vpop.xlane.xlu0 %1125  ;;  %v2593_v6 = vpop.f32.mrb[16].mxu1  ;;  %v1402_v15 = vrot.slane %v1096_v62, %v3509_v60  ;;  %v1398_v53 = vsel %vm1265_vm14, %v1397_v25, %v1393_v16 }
 0x1f0   : > { %v1708_v27 = vpop.f32.mrb[17].mxu1  ;;  %v1717_v8 = vadd.f32 %v2593_v6, %v3559_v0 }
 0x1f1   : > { %v1709_v35 = vadd.f32 %v3559_v0, %v1708_v27  ;;  %2652 = vmatpush3.msra.mxu0 %v1863_v26  ;;  %2763 = vmatpush3.bf16.msra.mxu1 %v2762_v31  ;;  %v2594_v63 = vpop.f32.mrb[18].mxu1  ;;  %v1403_v61 = vsel %vm1272_vm15, %v1402_v15, %v1398_v53  ;;  %v1407_v31 = vrot.slane %v3629_v21, %v3538_v7 }
 0x1f2   : > { %v1711_v34 = vpop.f32.mrb[19].mxu1  ;;  %2764 = vmatprep.subr.bf16.mxu1 %v2952_v55  ;;  %2779 = vmatprep.subr.bf16.mxu0 %v2952_v55  ;;  %v1869_v11 = vmax.f32 %v1717_v8, 0.0  ;;  %v1720_v19 = vadd.f32 %v2594_v63, %v3559_v0  ;;  %v1138_v57 = vpop.xlane.xlu1 %1137 }
 0x1f3   : > { %v1867_v18 = vmax.f32 %v1709_v35, 0.0  ;;  %v1120_v33 = vpop.xlane.xlu0 %1119  ;;  %v1712_v20 = vadd.f32 %v3559_v0, %v1711_v34  ;;  %2654 = vmatmul.mubr.msk.f32.vlgmr.msra.gmra.mrb[52].mxu0 %vm1904_vm2, %v3640_v39  ;;  %v1408_v1 = vsel %vm1279_vm0, %v1407_v31, %v1403_v61  ;;  %v1471_v35 = vrot.slane %v1138_v57, %v3538_v7 }
 0x1f4   : > { %v1441_v51 = vrot.slane %v1120_v33, %v3481_v37  ;;  %2711 = vmatprep.mubr.msk.f32.mxu0 %vm2953_vm4, %v2954_v49  ;;  %v1446_v37 = vrot.slane %v3607_v29, %v3485_v38  ;;  %v1451_v29 = vrot.slane %v1126_v41, %v3494_v13  ;;  %v1870_v54 = vmax.f32 %v1720_v19, 0.0 }
 0x1f5   : > { %v2765_v28 = vpack.c.bf16 %v1867_v18, %v1866_v17  ;;  %v1868_v3 = vmax.f32 %v1712_v20, 0.0  ;;  %v1476_v18 = vsel %vm1475_vm3, %v1408_v1, %v3563_v5 }
 0x1f6   : > { %v1442_v32 = vsel %vm1237_vm10, %v1441_v51, %v1437_v9 }
 0x1f7   : > { %v2768_v23 = vpack.c.bf16 %v1869_v11, %v1868_v3  ;;  %v1129_v42 = vpop.xlane.xlu0 %1128  ;;  %v2597_v44 = vpop.f32.mrb[20].mxu1  ;;  %2766 = vmatpush3.bf16.msra.mxu1 %v2765_v28  ;;  %v1447_v43 = vsel %vm1244_vm11, %v1446_v37, %v1442_v32 }
 0x1f8   : > { %v1724_v40 = vpop.f32.mrb[21].mxu1  ;;  %2767 = vmatprep.subr.bf16.mxu1 %v2952_v55  ;;  %v1733_v52 = vadd.f32 %v2597_v44, %v3559_v0  ;;  %v1452_v59 = vsel %vm1251_vm12, %v1451_v29, %v1447_v43  ;;  %v1456_v56 = vrot.slane %v1129_v42, %v3503_v58 }
 0x1f9   : > { %v1725_v48 = vadd.f32 %v3559_v0, %v1724_v40  ;;  %v2598_v38 = vpop.f32.mrb[22].mxu1 }
 0x1fa   : > { %v1727_v45 = vpop.f32.mrb[23].mxu1  ;;  %v1873_v24 = vmax.f32 %v1733_v52, 0.0  ;;  %v1736_v6 = vadd.f32 %v2598_v38, %v3559_v0  ;;  %v1457_v58 = vsel %vm1258_vm13, %v1456_v56, %v1452_v59 }
 0x1fb   : > { %v1871_v14 = vmax.f32 %v1725_v48, 0.0  ;;  %v1132_v22 = vpop.xlane.xlu0 %1131  ;;  %2769 = vmatpush3.bf16.msra.mxu1 %v2768_v23  ;;  %v1728_v2 = vadd.f32 %v3559_v0, %v1727_v45 }
 0x1fc   : > { %2770 = vmatprep.subr.bf16.mxu1 %v2952_v55  ;;  %v1461_v13 = vrot.slane %v1132_v22, %v3506_v50  ;;  %v1874_v33 = vmax.f32 %v1736_v6, 0.0 }
 0x1fd   : > { %v2771_v26 = vpack.c.bf16 %v1871_v14, %v1870_v54  ;;  %v1872_v47 = vmax.f32 %v1728_v2, 0.0 }
 0x1fe   : > { %v1462_v21 = vsel %vm1265_vm14, %v1461_v13, %v1457_v58 }
 0x1ff   : > { %v1135_v41 = vpop.xlane.xlu0 %1134  ;;  %2772 = vmatpush3.bf16.msra.mxu1 %v2771_v26  ;;  %v2774_v36 = vpack.c.bf16 %v1873_v24, %v1872_v47  ;;  %v2601_v4 = vpop.f32.mrb[24].mxu1 }
 0x200   : > { %v1466_v27 = vrot.slane %v1135_v41, %v3509_v60  ;;  %v1749_v50 = vadd.f32 %v2601_v4, %v3559_v0  ;;  %v1740_v8 = vpop.f32.mrb[25].mxu1  ;;  %2773 = vmatprep.subr.bf16.mxu1 %v2952_v55 }
 0x201   : > { %v1741_v63 = vadd.f32 %v3559_v0, %v1740_v8  ;;  %v2602_v12 = vpop.f32.mrb[26].mxu1 }
 0x202   : > { %v1467_v10 = vsel %vm1272_vm15, %v1466_v27, %v1462_v21  ;;  %v1752_v60 = vadd.f32 %v2602_v12, %v3559_v0  ;;  %v1743_v34 = vpop.f32.mrb[27].mxu1  ;;  %v1877_v7 = vmax.f32 %v1749_v50, 0.0 }
 0x203   : > { %v1472_v17 = vsel %vm1279_vm0, %v1471_v35, %v1467_v10  ;;  %v1875_v20 = vmax.f32 %v1741_v63, 0.0  ;;  %2775 = vmatpush3.bf16.msra.mxu1 %v2774_v36  ;;  %v1744_v11 = vadd.f32 %v3559_v0, %v1743_v34 }
 0x204   : > { %v1478_v46 = vsel %vm1477_vm5, %v1472_v17, %v1476_v18  ;;  %2776 = vmatprep.subr.bf16.mxu1 %v2952_v55  ;;  %v1878_v51 = vmax.f32 %v1752_v60, 0.0 }
 0x205   : > { %v1481_v9 = vsel %vm1480_vm6, %v1478_v46, 0.0  ;;  %v2777_v62 = vpack.c.bf16 %v1875_v20, %v1874_v33  ;;  %v1876_v5 = vmax.f32 %v1744_v11, 0.0 }
 0x206   : > { %1482 = vadd.xlane.f32.xlu0 %v1481_v9  ;;  %v2780_v28 = vpack.c.bf16 %v1878_v51, %v1877_v7 }
 0x207   : > { %2778 = vmatpush3.bf16.msra.mxu1 %v2777_v62  ;;  %v2605_v3 = vpop.f32.mrb[28].mxu1 }
 0x208   : > { %v1765_v30 = vadd.f32 %v2605_v3, %v3559_v0  ;;  %v1756_v32 = vpop.f32.mrb[29].mxu1  ;;  %2680 = vmatprep.subr.mxu1 %v2954_v49  ;;  %2781 = vmatpush3.bf16.msra.mxu0 %v2780_v28 }
 0x209   : > { %v1757_v25 = vadd.f32 %v3559_v0, %v1756_v32  ;;  %v2606_v37 = vpop.f32.mrb[30].mxu1  ;;  %2782 = vmatprep.subr.bf16.mxu0 %v2952_v55 }
 0x20a   : > { %v1768_v19 = vadd.f32 %v2606_v37, %v3559_v0  ;;  %v1759_v23 = vpop.f32.mrb[31].mxu1  ;;  %v1881_v44 = vmax.f32 %v1765_v30, 0.0 }
 0x20b   : > { %v1760_v42 = vadd.f32 %v3559_v0, %v1759_v23  ;;  %2681 = vmatpush3.msra.mxu1 %v1876_v5  ;;  %v1879_v15 = vmax.f32 %v1757_v25, 0.0 }
 0x20c   : > { %v1882_v16 = vmax.f32 %v1768_v19, 0.0  ;;  %2797 = vmatprep.subr.bf16.mxu1 %v2952_v55  ;;  %2683 = vmatmul.mubr.msk.f32.vlgmr.msra.gmra.mrb[52].mxu1 %vm1904_vm2, %v3640_v39 }
 0x20d   : > { %v1880_v40 = vmax.f32 %v1760_v42, 0.0  ;;  %2740 = vmatprep.mubr.msk.f32.mxu1 %vm2953_vm4, %v2954_v49  ;;  %vm1492_vm4 = vcmask 3072  }
 0x20e   : > { %v2786_v43 = vpack.c.bf16 %v1882_v16, %v1881_v44 }
 0x20f   : > { %v2783_v52 = vpack.c.bf16 %v1880_v40, %v1879_v15  ;;  %v2609_v48 = vpop.f32.mrb[32].mxu1 }
 0x210   : > { %v1781_v38 = vadd.f32 %v2609_v48, %v3559_v0  ;;  %v1772_v29 = vpop.f32.mrb[33].mxu1 }
 0x211   : > { %v1773_v45 = vadd.f32 %v3559_v0, %v1772_v29  ;;  %v2610_v53 = vpop.f32.mrb[34].mxu1  ;;  %2784 = vmatpush3.bf16.msra.mxu0 %v2783_v52 }
 0x212   : > { %v1784_v54 = vadd.f32 %v2610_v53, %v3559_v0  ;;  %v1775_v14 = vpop.f32.mrb[35].mxu1  ;;  %2785 = vmatprep.subr.bf16.mxu0 %v2952_v55  ;;  %v1885_v2 = vmax.f32 %v1781_v38, 0.0 }
 0x213   : > { %v1776_v22 = vadd.f32 %v3559_v0, %v1775_v14  ;;  %v1883_v59 = vmax.f32 %v1773_v45, 0.0 }
 0x214   : > { %v1886_v61 = vmax.f32 %v1784_v54, 0.0 }
 0x215   : > { %v1884_v56 = vmax.f32 %v1776_v22, 0.0  ;;  %2787 = vmatpush3.bf16.msra.mxu0 %v2786_v43 }
 0x216   : > { %v2792_v24 = vpack.c.bf16 %v1886_v61, %v1885_v2  ;;  %2788 = vmatprep.subr.bf16.mxu0 %v2952_v55  ;;  %v2368_v61 = vld [vmem:[#allocation2] ss:$0 sm:$0xff] }
 0x217   : > { %v2789_v26 = vpack.c.bf16 %v1884_v56, %v1883_v59  ;;  %v2613_v13 = vpop.f32.mrb[36].mxu1 }
 0x218   : > { %v1788_v47 = vpop.f32.mrb[37].mxu1  ;;  %v1797_v58 = vadd.f32 %v2613_v13, %v3559_v0 }
 0x219   : > { %v1789_v31 = vadd.f32 %v3559_v0, %v1788_v47  ;;  %v2614_v57 = vpop.f32.mrb[38].mxu1  ;;  %2790 = vmatpush3.bf16.msra.mxu0 %v2789_v26 }
 0x21a   : > { %v1791_v41 = vpop.f32.mrb[39].mxu1  ;;  %2791 = vmatprep.subr.bf16.mxu0 %v2952_v55  ;;  %v1800_v27 = vadd.f32 %v2614_v57, %v3559_v0  ;;  %v1889_v10 = vmax.f32 %v1797_v58, 0.0 }
 0x21b   : > { %v1792_v6 = vadd.f32 %v3559_v0, %v1791_v41  ;;  %v1887_v36 = vmax.f32 %v1789_v31, 0.0 }
 0x21c   : > { %v1890_v60 = vmax.f32 %v1800_v27, 0.0 }
 0x21d   : > { %v1888_v4 = vmax.f32 %v1792_v6, 0.0  ;;  %2793 = vmatpush3.bf16.msra.mxu0 %v2792_v24 }
 0x21e   : > { %2794 = vmatprep.subr.bf16.mxu0 %v2952_v55 }
 0x21f   : > { %v2795_v1 = vpack.c.bf16 %v1888_v4, %v1887_v36  ;;  %v2617_v50 = vpop.f32.mrb[40].mxu1 }
 0x220   : > { %v1804_v8 = vpop.f32.mrb[41].mxu1  ;;  %v1813_v21 = vadd.f32 %v2617_v50, %v3559_v0 }
 0x221   : > { %v1805_v35 = vadd.f32 %v3559_v0, %v1804_v8  ;;  %v2618_v63 = vpop.f32.mrb[42].mxu1  ;;  %2796 = vmatpush3.bf16.msra.mxu0 %v2795_v1 }
 0x222   : > { %v1807_v12 = vpop.f32.mrb[43].mxu1  ;;  %2709 = vmatprep.subr.mxu0 %v2954_v49  ;;  %v1893_v18 = vmax.f32 %v1813_v21, 0.0  ;;  %v1816_v46 = vadd.f32 %v2618_v63, %v3559_v0 }
 0x223   : > { %v1891_v34 = vmax.f32 %v1805_v35, 0.0  ;;  %v1808_v17 = vadd.f32 %v3559_v0, %v1807_v12 }
 0x224   : > { %v1894_v30 = vmax.f32 %v1816_v46, 0.0 }
 0x225   : > { %v2798_v33 = vpack.c.bf16 %v1891_v34, %v1890_v60  ;;  %v1892_v20 = vmax.f32 %v1808_v17, 0.0  ;;  %2710 = vmatpush3.msra.mxu0 %v1889_v10 }
 0x226   : > { %2712 = vmatmul.mubr.msk.f32.vlgmr.msra.gmra.mrb[54].mxu0 %vm1904_vm2, %v3640_v39 }
 0x227   : > { %v2801_v7 = vpack.c.bf16 %v1893_v18, %v1892_v20  ;;  %v2621_v51 = vpop.f32.mrb[44].mxu1  ;;  %2799 = vmatpush3.bf16.msra.mxu1 %v2798_v33 }
 0x228   : > { %v1820_v9 = vpop.f32.mrb[45].mxu1  ;;  %2800 = vmatprep.subr.bf16.mxu1 %v2952_v55  ;;  %v1829_v62 = vadd.f32 %v2621_v51, %v3559_v0 }
 0x229   : > { %v1821_v11 = vadd.f32 %v3559_v0, %v1820_v9  ;;  %v2622_v28 = vpop.f32.mrb[46].mxu1 }
 0x22a   : > { %v1823_v3 = vpop.f32.mrb[47].mxu1  ;;  %v1897_v25 = vmax.f32 %v1829_v62, 0.0  ;;  %v1832_v23 = vadd.f32 %v2622_v28, %v3559_v0 }
 0x22b   : > { %v1895_v32 = vmax.f32 %v1821_v11, 0.0  ;;  %2802 = vmatpush3.bf16.msra.mxu1 %v2801_v7  ;;  %v1824_v5 = vadd.f32 %v3559_v0, %v1823_v3 }
 0x22c   : > { %2803 = vmatprep.subr.bf16.mxu1 %v2952_v55  ;;  %v1898_v48 = vmax.f32 %v1832_v23, 0.0 }
 0x22d   : > { %v2804_v37 = vpack.c.bf16 %v1895_v32, %v1894_v30  ;;  %v1896_v19 = vmax.f32 %v1824_v5, 0.0 }
 0x22f   : > { %v2807_v42 = vpack.c.bf16 %v1897_v25, %v1896_v19  ;;  %v2625_v44 = vpop.f32.mrb[48].mxu1  ;;  %2805 = vmatpush3.bf16.msra.mxu1 %v2804_v37 }
 0x230   : > { %v1836_v16 = vpop.f32.mrb[49].mxu1  ;;  %2806 = vmatprep.subr.bf16.mxu1 %v2952_v55  ;;  %v1845_v15 = vadd.f32 %v2625_v44, %v3559_v0 }
 0x231   : > { %v1837_v40 = vadd.f32 %v3559_v0, %v1836_v16  ;;  %v2626_v43 = vpop.f32.mrb[50].mxu1 }
 0x232   : > { %v1839_v52 = vpop.f32.mrb[51].mxu1  ;;  %v1901_v45 = vmax.f32 %v1845_v15, 0.0  ;;  %v1848_v22 = vadd.f32 %v2626_v43, %v3559_v0 }
 0x233   : > { %v1899_v38 = vmax.f32 %v1837_v40, 0.0  ;;  %2808 = vmatpush3.bf16.msra.mxu1 %v2807_v42  ;;  %v1840_v29 = vadd.f32 %v3559_v0, %v1839_v52 }
 0x234   : > { %2809 = vmatprep.subr.bf16.mxu1 %v2952_v55  ;;  %v1902_v2 = vmax.f32 %v1848_v22, 0.0 }
 0x235   : > { %v2810_v53 = vpack.c.bf16 %v1899_v38, %v1898_v48  ;;  %v1900_v54 = vmax.f32 %v1840_v29, 0.0 }
 0x237   : > { %v2813_v14 = vpack.c.bf16 %v1901_v45, %v1900_v54  ;;  %2811 = vmatpush3.bf16.msra.mxu1 %v2810_v53 }
 0x238   : > { %2812 = vmatprep.subr.bf16.mxu1 %v2952_v55 }
 0x23b   : > { %2814 = vmatpush3.bf16.msra.mxu1 %v2813_v14 }
 0x23c   : > { %2738 = vmatprep.subr.mxu1 %v2954_v49 }
 0x23f   : > { %2739 = vmatpush3.msra.mxu1 %v1902_v2 }
 0x240   : > { %2741 = vmatmul.mubr.msk.f32.vlgmr.msra.gmra.mrb[54].mxu1 %vm1904_vm2, %v3640_v39 }
 0x293   : > { %v1483_v55 = vpop.xlane.xlu0 %1482 }
 0x294   : > { %v1491_v59 = vadd.f32 %v2368_v61, %v1483_v55 }
 0x296   : > { %1493 = vst.msk [vmem:[%s349_s28] sm:$0xf] %vm1492_vm4, %v1491_v59 }
 0x2c6   : > { %v1974_v49 = vpop.f32.mrb[52].mxu0 }
 0x2c7   : > { %v1978_v0 = vpack.c.bf16 %v1974_v49, %v1974_v49  ;;  %v2655_v56 = vpop.f32.mrb[53].mxu0 }
 0x2c9   : > { %1980 = vst.msk [vmem:[%s331_s10] sm:$0x3] %vm1979_vm7, %v1978_v0 }
 0x2df   : > { %v2047_v39 = vpop.f32.mrb[52].mxu1 }
 0x2e0   : > { %v2051_v24 = vpack.c.bf16 %v2047_v39, %v2047_v39  ;;  %v2684_v26 = vpop.f32.mrb[53].mxu1 }
 0x2e2   : > { %2398 = vst.msk [vmem:[%s331_s10 + $0x2] sm:$0x3] %vm1979_vm7, %v2051_v24 }
 0x2f9   : > { %v2120_v13 = vpop.f32.mrb[54].mxu0 }
 0x2fa   : > { %v2124_v47 = vpack.c.bf16 %v2120_v13, %v2120_v13  ;;  %v2713_v31 = vpop.f32.mrb[55].mxu0 }
 0x2fc   : > { %2400 = vst.msk [vmem:[%s331_s10 + $0x4] sm:$0x3] %vm1979_vm7, %v2124_v47 }
 0x313   : > { %v2193_v57 = vpop.f32.mrb[54].mxu1 }
 0x314   : > { %v2197_v41 = vpack.c.bf16 %v2193_v57, %v2193_v57  ;;  %v2742_v6 = vpop.f32.mrb[55].mxu1 }
 0x316   : > { %2402 = vst.msk [vmem:[%s331_s10 + $0x6] sm:$0x3] %vm1979_vm7, %v2197_v41 }
 0x317   : > { %2901 = shalt.err (!%p2898_p4)
}
 0x318   : > { %s2902_s28 = scalar_lea.hbm %s3759_s23, 128  ;;  %s2906_s10 = scalar_lea.hbm %s3811_s8, 256 }
 0x319   : > { %p2903_p7 = scmp.ne.s32.totalorder %s3759_s23, %s2902_s28  ;;  %p2907_p10 = scmp.lt.u32.totalorder %s3759_s23, %s3811_s8 }
 0x31a   : > { %p2908_p11 = scmp.lt.u32.totalorder %s2906_s10, %s2902_s28  ;;  %p2910_p13 = scmp.lt.u32.totalorder %s2902_s28, %s3759_s23 }
 0x31b   : > { %p2904_p8 = pnand %p2903_p7, %p3049_p5 }
 0x31c   : > { %p2909_p12 = por %p2908_p11, %p2907_p10 }
 0x31d   : > { %p2905_p9 = pneg %p2904_p8 }
 0x31e   : > { %p2911_p0 = por %p2910_p13, %p2909_p12 }
 0x320   : > { %p2912_p1 = pnand %p2911_p0, %p2905_p9 }
 0x322   : > { %2915 = shalt.err (!%p2912_p1)
}
 0x323   : > { %s2956_s22 = smov 32   ;;  %s2957_s25 = smov 2  }
 0x324   : > { %2818 = dma.vmem_to_hbm [thread:$0]  (%p3049_p5), %s3754_s15, 128, %s3759_s23, %s3762_s24, %s2956_s22, %s2956_s22, %s2957_s25  }
 0x325 PF: > { %p2824_p2 = scmp.ge.s32.totalorder %s2950_s14, 2  ;;  %s2236_s6 = sand.u32 1, %s2938_s11  }
 0x326   : > { %s2237_s26 = scalar_lea.sflag [#allocation4], %s2236_s6 }
 0x327   : > { %p2821_p3 = pnand %p2824_p2, %p3053_p6 }
 0x329   : > { %2933 = dma.done.wait (!%p2821_p3), %s2237_s26, 128  }
 0x32a   : > { %2935 = vsyncadd (!%p2821_p3), %s2237_s26, 4294967168  ;;  %p22_p4 = scmp.ge.s32.totalorder %s3036_s16, 4   ;;  %s3815_s11 = smov %s2942_s12 }
 0x32b   : > { %s3816_s12 = smov %s2946_s13  ;;  %s3817_s13 = smov %s3047_s19 }
 0x32c   : > { %s3818_s14 = smov %s3036_s16  ;;  %24 = sbr.rel (!%p22_p4) target bundleno = 6 (0x6), region = 102 }
 0x333   :  { %2249 = vsyncpa [#allocation4], 1 }
 0x334   :  { %2251 = vsyncpa [#allocation4 + $0x1], 1 }

</bundles_post_ra>
